<compile_context>
chip_gen: v7x
topology: tpu7x:2x2x1
jax: 0.10.0
libtpu: 0.0.40
codegen_flags: <defaults>
</compile_context>

<pallas_src>
import jax
import jax.numpy as jnp
from jax.experimental import pallas as pl
from jax.experimental.pallas import tpu as pltpu

BN_EPS = 1e-5


def _make_kernel(nb, c_in, c_out, tl, length, inv_count, use_vpu_matvec, has_tail):
    def kernel(x_ref, w_ref, gb_ref, o_ref, sum_ref, ssq_ref, scale_ref, shift_ref):
        p = pl.program_id(0)   # phase: 0 = stats, 1 = emit
        i = pl.program_id(1)   # batch-block index
        j = pl.program_id(2)   # L-tile index

        @pl.when((p == 0) & (i == 0) & (j == 0))
        def _init():
            sum_ref[...] = jnp.zeros_like(sum_ref)
            ssq_ref[...] = jnp.zeros_like(ssq_ref)

        w = w_ref[...]   # (C_out, C_in): f32 on the VPU path, native dtype on MXU

        if has_tail:
            # Ragged L: zero lanes past the true length so the conv/stats see
            # exact zeros (boundary-block HBM reads are unspecified past L).
            # Out-of-bounds lanes of the boundary output block are dropped on
            # writeback by Pallas, so only the stats need the mask.
            rem = length - j * tl
            lane = jax.lax.broadcasted_iota(jnp.int32, (c_in, tl), 1)
            lane_mask = lane < rem

        def conv_tile(b):
            x_b = x_ref[b]                       # (C_in, TL), native dtype
            if has_tail:
                x_b = jnp.where(lane_mask, x_b, jnp.zeros_like(x_b))
            if use_vpu_matvec:
                # Tiny contraction: the MXU would be nearly empty, use
                # unrolled VPU broadcast-FMAs in f32 instead.
                xf = x_b.astype(jnp.float32)
                y = w[:, 0:1] * xf[0:1, :]
                for c in range(1, c_in):
                    y = y + w[:, c:c + 1] * xf[c:c + 1, :]
            else:
                # Native-dtype operands straight into the MXU, f32 accumulate
                # (no full-tile f32 pre-cast of x).
                y = jnp.dot(w, x_b, preferred_element_type=jnp.float32)
            return y                              # (C_out, TL) f32

        @pl.when(p == 0)
        def _accumulate_stats():
            # TODO(synk): optional headroom - accumulate x-only stats (sum_x and
            # the C_in x C_in Gram) and derive sum_y / ssq_y once at phase-1 start.
            for b in range(nb):
                y = conv_tile(b)
                sum_ref[...] += jnp.sum(y, axis=-1, keepdims=True)
                ssq_ref[...] += jnp.sum(y * y, axis=-1, keepdims=True)

        @pl.when((p == 1) & (i == 0) & (j == 0))
        def _fold_bn():
            # Fold BN once per kernel invocation into (scale, shift).
            mean = sum_ref[...] * inv_count
            # Clamp E[y^2] - mean^2 at 0 to guard against catastrophic
            # cancellation driving rsqrt into NaN territory.
            var = jnp.maximum(ssq_ref[...] * inv_count - mean * mean, 0.0)
            gamma = gb_ref[:, 0:1]
            beta = gb_ref[:, 1:2]
            scale = gamma * jax.lax.rsqrt(var + BN_EPS)
            scale_ref[...] = scale
            shift_ref[...] = beta - mean * scale

        @pl.when(p == 1)
        def _emit():
            scale = scale_ref[...]                # (C_out, 1)
            shift = shift_ref[...]                # (C_out, 1)
            for b in range(nb):
                y = conv_tile(b)
                o_ref[b] = jnp.maximum(y * scale + shift, 0.0).astype(o_ref.dtype)

    return kernel


def _vmem_capacity_bytes():
    try:
        cap = getattr(pltpu.get_tpu_info(), "vmem_capacity_bytes", None)
        if cap:
            return int(cap)
    except Exception:
        pass
    return 64 * 1024 * 1024   # conservative fallback (v7x-sized VMEM)


def _pick_tiles(n, length, c_in, c_out, in_itemsize, out_itemsize, use_vpu,
                tile_budget, max_tile_lanes=None):
    # Per-lane, per-batch-element VMEM bytes: double-buffered input and output
    # tiles plus the materialized f32 y intermediate and (on the VPU path) the
    # f32 cast copy of x.
    per_lane = (2 * c_in * in_itemsize + 2 * c_out * out_itemsize
                + 4 * c_out + (4 * c_in if use_vpu else 0))
    if max_tile_lanes is not None:
        max_lanes = max(128, int(max_tile_lanes))
    else:
        max_lanes = max(128, tile_budget // per_lane)

    if length <= max_lanes:
        tl, has_tail = length, False
    else:
        cap = (max_lanes // 128) * 128
        best_div = None
        for cand in range(cap, 127, -128):        # largest 128-multiple divisor
            if length % cand == 0:
                best_div = cand
                break
        if best_div is not None and best_div * 2 >= cap:
            tl, has_tail = best_div, False        # exact tiling, no tail mask
        else:
            tl, has_tail = cap, (length % cap) != 0   # big tile + masked tail
    num_l = -(-length // tl)

    # Batch blocking: merge batch elements per grid step when C*TL tiles are
    # tiny, to amortize the fixed per-grid-step overhead (cap unroll at 8).
    nb_cap = max(1, min(n, 8, max_lanes // tl))
    nb = 1
    for cand in range(nb_cap, 0, -1):
        if n % cand == 0:
            nb = cand
            break
    return nb, tl, num_l, has_tail


def residual_forward(x, w, b, gamma, beta, *, max_tile_lanes=None,
                     vpu_matvec_max_cin=8):
    """x: (N, C_in, L) NCW. w: Conv1d weight (C_out, C_in[, 1]). Returns (N, C_out, L)."""
    del b  # conv bias cancels exactly under train-mode BatchNorm (mean-subtracted)
    n, c_in, length = x.shape
    c_out = gamma.shape[0]

    # VPU-matvec vs MXU crossover.
    # TODO(synk): sweep per generation (~8 on v5e, up to ~16-32 on v6e/v7x).
    use_vpu = c_in <= vpu_matvec_max_cin

    # Weight in the compute dtype: native dtype for the MXU path, f32 for the
    # unrolled VPU path.  Tiny one-time wrapper cast.
    w2 = w.reshape(c_out, c_in).astype(jnp.float32 if use_vpu else x.dtype)
    # Pack gamma/beta into one tiny operand -> one grid-invariant DMA.
    gb = jnp.stack([gamma.astype(jnp.float32), beta.astype(jnp.float32)], axis=-1)

    vmem_cap = _vmem_capacity_bytes()
    tile_budget = int(vmem_cap * 0.375)   # v5e/v6e (128 MiB): 48 MiB, v7x (64 MiB): 24 MiB
    vmem_limit = int(vmem_cap * 0.75)     # v5e/v6e: 96 MiB, v7x: 48 MiB

    nb, tl, num_l, has_tail = _pick_tiles(
        n, length, c_in, c_out, x.dtype.itemsize, x.dtype.itemsize, use_vpu,
        tile_budget, max_tile_lanes)

    kernel = _make_kernel(nb, c_in, c_out, tl, length, 1.0 / float(n * length),
                          use_vpu, has_tail)

    # TODO(synk): on v7x, split into stats + emit pallas_calls (or core_map with
    # CMEM partial stats) so both TensorCores are used instead of all-"arbitrary".
    # TODO(synk): for strong down-projections (c_in > 2*c_out), write pre-BN y in
    # phase 0 and re-read it in phase 1 instead of re-reading x and re-convolving.
    return pl.pallas_call(
        kernel,
        out_shape=jax.ShapeDtypeStruct((n, c_out, length), x.dtype),
        grid=(2, n // nb, num_l),
        in_specs=[
            # Native NCW layout: channels in sublanes, L tile on the lane axis.
            pl.BlockSpec((nb, c_in, tl), lambda p, i, j: (i, 0, j)),
            pl.BlockSpec((c_out, c_in), lambda p, i, j: (0, 0)),
            pl.BlockSpec((c_out, 2), lambda p, i, j: (0, 0)),
        ],
        # Phase 0 pins the output window to block (0,0,0): nothing is flushed
        # to HBM until phase 1 overwrites it with real data (single writeback).
        out_specs=pl.BlockSpec((nb, c_out, tl), lambda p, i, j: (i * p, 0, j * p)),
        scratch_shapes=[pltpu.VMEM((c_out, 1), jnp.float32),   # sum(y)
                        pltpu.VMEM((c_out, 1), jnp.float32),   # sum(y*y)
                        pltpu.VMEM((c_out, 1), jnp.float32),   # folded BN scale
                        pltpu.VMEM((c_out, 1), jnp.float32)],  # folded BN shift
        compiler_params=pltpu.CompilerParams(
            # BN stats accumulate across batch and L tiles, and phase 1 reads
            # phase 0's scratch => all grid axes stay "arbitrary".
            dimension_semantics=("arbitrary", "arbitrary", "arbitrary"),
            vmem_limit_bytes=vmem_limit),
    )(x, w2, gb)


def residual_reference(x, w, b, gamma, beta):
    """Plain-JAX reference matching PyTorch Conv1d(k=1)+BatchNorm1d(train)+ReLU."""
    c_out = gamma.shape[0]
    w2 = w.reshape(c_out, -1)
    y = jnp.einsum("oc,ncl->nol", w2, x) + b[None, :, None]
    mean = jnp.mean(y, axis=(0, 2), keepdims=True)
    var = jnp.mean(jnp.square(y - mean), axis=(0, 2), keepdims=True)
    y = (y - mean) / jnp.sqrt(var + BN_EPS)
    y = gamma[None, :, None] * y + beta[None, :, None]
    return jnp.maximum(y, 0.0)


if __name__ == "__main__":
    key = jax.random.PRNGKey(0)
    kx, kw, kb, kg, kbe = jax.random.split(key, 5)

    N, C_IN, C_OUT, L = 3, 4, 8, 512

    x = jax.random.normal(kx, (N, C_IN, L), dtype=jnp.float32)
    # Conv1d(C_IN, C_OUT, kernel_size=1) parameters (PyTorch weight layout).
    w = jax.random.normal(kw, (C_OUT, C_IN, 1), dtype=jnp.float32) * 0.5
    b = jax.random.normal(kb, (C_OUT,), dtype=jnp.float32) * 0.1
    # BatchNorm1d(C_OUT) affine parameters.
    gamma = 1.0 + 0.1 * jax.random.normal(kg, (C_OUT,), dtype=jnp.float32)
    beta = 0.1 * jax.random.normal(kbe, (C_OUT,), dtype=jnp.float32)

    ref = jax.block_until_ready(residual_reference(x, w, b, gamma, beta))

    # Auto (VMEM-budget-derived) tile: whole L per tile, batch-blocked grid step.
    out = jax.block_until_ready(residual_forward(x, w, b, gamma, beta))
    assert out.shape == (N, C_OUT, L)
    assert jnp.allclose(out, ref, atol=1e-4, rtol=1e-4), "mismatch (auto tile)"

    # Small forced tile exercising multiple batch blocks and L tiles (grid=(2,3,4)).
    out2 = jax.block_until_ready(
        residual_forward(x, w, b, gamma, beta, max_tile_lanes=128))
    assert jnp.allclose(out2, ref, atol=1e-4, rtol=1e-4), "mismatch (tiled L)"

    # Ragged L exercising the masked tail tile (L=200, tl=128 -> 2 tiles, 72 tail).
    Lr = 200
    xr = jax.random.normal(kx, (N, C_IN, Lr), dtype=jnp.float32)
    refr = jax.block_until_ready(residual_reference(xr, w, b, gamma, beta))
    outr = jax.block_until_ready(
        residual_forward(xr, w, b, gamma, beta, max_tile_lanes=128))
    assert jnp.allclose(outr, refr, atol=1e-4, rtol=1e-4), "mismatch (ragged L)"

    # MXU path (c_in above the VPU crossover), native-dtype operands into jnp.dot.
    C_IN2, C_OUT2 = 32, 16
    x3 = jax.random.normal(kx, (N, C_IN2, L), dtype=jnp.float32)
    w3 = jax.random.normal(kw, (C_OUT2, C_IN2, 1), dtype=jnp.float32) * 0.2
    b3 = jax.random.normal(kb, (C_OUT2,), dtype=jnp.float32) * 0.1
    g3 = 1.0 + 0.1 * jax.random.normal(kg, (C_OUT2,), dtype=jnp.float32)
    be3 = 0.1 * jax.random.normal(kbe, (C_OUT2,), dtype=jnp.float32)
    ref3 = jax.block_until_ready(residual_reference(x3, w3, b3, g3, be3))
    out3 = jax.block_until_ready(residual_forward(x3, w3, b3, g3, be3))
    assert jnp.allclose(out3, ref3, atol=2e-3, rtol=2e-3), "mismatch (MXU path)"

    print("KERNEL_OK")
</pallas_src>

<mosaic_0001>
module attributes {stable_mosaic.version = 11 : i64} {
  func.func @kernel(%arg0: i32, %arg1: i32, %arg2: i32, %arg3: memref<3x4x512xf32, #tpu.memory_space<vmem>>, %arg4: memref<8x4xf32, #tpu.memory_space<vmem>>, %arg5: memref<8x2xf32, #tpu.memory_space<vmem>>, %arg6: memref<3x8x512xf32, #tpu.memory_space<vmem>>, %arg7: memref<8x1xf32, #tpu.memory_space<vmem>>, %arg8: memref<8x1xf32, #tpu.memory_space<vmem>>, %arg9: memref<8x1xf32, #tpu.memory_space<vmem>>, %arg10: memref<8x1xf32, #tpu.memory_space<vmem>>) attributes {dimension_semantics = [#tpu.dimension_semantics<arbitrary>, #tpu.dimension_semantics<arbitrary>, #tpu.dimension_semantics<arbitrary>], iteration_bounds = array<i64: 2, 1, 1>, scalar_prefetch = 0 : i64, scratch_operands = 4 : i64, tpu.core_type = #tpu.core_type<tc>, window_params = [{transform_indices = @transform_0, window_bounds = array<i64: 3, 4, 512>}, {pipeline_mode = #tpu.pipeline_mode<synchronous>, transform_indices = @transform_1, window_bounds = array<i64: 8, 4>}, {pipeline_mode = #tpu.pipeline_mode<synchronous>, transform_indices = @transform_2, window_bounds = array<i64: 8, 2>}, {transform_indices = @transform_3, window_bounds = array<i64: 3, 8, 512>}]} {
    %c0_i32 = arith.constant 0 : i32
    %0 = arith.cmpi eq, %arg0, %c0_i32 : i32
    %c0_i32_0 = arith.constant 0 : i32
    %1 = arith.cmpi eq, %arg1, %c0_i32_0 : i32
    %2 = arith.andi %0, %1 : i1
    %c0_i32_1 = arith.constant 0 : i32
    %3 = arith.cmpi eq, %arg2, %c0_i32_1 : i32
    %4 = arith.andi %2, %3 : i1
    %5 = arith.extui %4 : i1 to i32
    %c0_i32_2 = arith.constant 0 : i32
    %6 = arith.cmpi ne, %5, %c0_i32_2 : i32
    scf.if %6 {
      %cst = arith.constant 0.000000e+00 : f32
      %21 = vector.broadcast %cst : f32 to vector<8x1xf32>
      %c0_11 = arith.constant 0 : index
      %c0_12 = arith.constant 0 : index
      %22 = vector.load %arg7[%c0_11, %c0_12] : memref<8x1xf32, #tpu.memory_space<vmem>>, vector<8x1xf32>
      tpu.vector_store %arg7[%c0_11, %c0_12], %21 {strides = array<i32>} : memref<8x1xf32, #tpu.memory_space<vmem>>, vector<8x1xf32>,
      %cst_13 = arith.constant 0.000000e+00 : f32
      %23 = vector.broadcast %cst_13 : f32 to vector<8x1xf32>
      %c0_14 = arith.constant 0 : index
      %c0_15 = arith.constant 0 : index
      %24 = vector.load %arg8[%c0_14, %c0_15] : memref<8x1xf32, #tpu.memory_space<vmem>>, vector<8x1xf32>
      tpu.vector_store %arg8[%c0_14, %c0_15], %23 {strides = array<i32>} : memref<8x1xf32, #tpu.memory_space<vmem>>, vector<8x1xf32>,
    } else {
    }
    %c0 = arith.constant 0 : index
    %c0_3 = arith.constant 0 : index
    %7 = vector.load %arg4[%c0, %c0_3] : memref<8x4xf32, #tpu.memory_space<vmem>>, vector<8x4xf32>
    %c0_i32_4 = arith.constant 0 : i32
    %8 = arith.cmpi eq, %arg0, %c0_i32_4 : i32
    %9 = arith.extui %8 : i1 to i32
    %c0_i32_5 = arith.constant 0 : i32
    %10 = arith.cmpi ne, %9, %c0_i32_5 : i32
    scf.if %10 {
      %c0_11 = arith.constant 0 : index
      %c0_12 = arith.constant 0 : index
      %c0_13 = arith.constant 0 : index
      %21 = vector.load %arg3[%c0_11, %c0_12, %c0_13] : memref<3x4x512xf32, #tpu.memory_space<vmem>>, vector<1x4x512xf32>
      %22 = vector.shape_cast %21 : vector<1x4x512xf32> to vector<4x512xf32>
      %23 = vector.extract_strided_slice %7 {offsets = [0, 0], sizes = [8, 1], strides = [1, 1]} : vector<8x4xf32> to vector<8x1xf32>
      %24 = vector.extract_strided_slice %22 {offsets = [0, 0], sizes = [1, 512], strides = [1, 1]} : vector<4x512xf32> to vector<1x512xf32>
      %25 = vector.broadcast %23 : vector<8x1xf32> to vector<8x512xf32>
      %26 = vector.broadcast %24 : vector<1x512xf32> to vector<8x512xf32>
      %27 = arith.mulf %25, %26 : vector<8x512xf32>
      %28 = vector.extract_strided_slice %7 {offsets = [0, 1], sizes = [8, 1], strides = [1, 1]} : vector<8x4xf32> to vector<8x1xf32>
      %29 = vector.extract_strided_slice %22 {offsets = [1, 0], sizes = [1, 512], strides = [1, 1]} : vector<4x512xf32> to vector<1x512xf32>
      %30 = vector.broadcast %28 : vector<8x1xf32> to vector<8x512xf32>
      %31 = vector.broadcast %29 : vector<1x512xf32> to vector<8x512xf32>
      %32 = arith.mulf %30, %31 : vector<8x512xf32>
      %33 = arith.addf %27, %32 : vector<8x512xf32>
      %34 = vector.extract_strided_slice %7 {offsets = [0, 2], sizes = [8, 1], strides = [1, 1]} : vector<8x4xf32> to vector<8x1xf32>
      %35 = vector.extract_strided_slice %22 {offsets = [2, 0], sizes = [1, 512], strides = [1, 1]} : vector<4x512xf32> to vector<1x512xf32>
      %36 = vector.broadcast %34 : vector<8x1xf32> to vector<8x512xf32>
      %37 = vector.broadcast %35 : vector<1x512xf32> to vector<8x512xf32>
      %38 = arith.mulf %36, %37 : vector<8x512xf32>
      %39 = arith.addf %33, %38 : vector<8x512xf32>
      %40 = vector.extract_strided_slice %7 {offsets = [0, 3], sizes = [8, 1], strides = [1, 1]} : vector<8x4xf32> to vector<8x1xf32>
      %41 = vector.extract_strided_slice %22 {offsets = [3, 0], sizes = [1, 512], strides = [1, 1]} : vector<4x512xf32> to vector<1x512xf32>
      %42 = vector.broadcast %40 : vector<8x1xf32> to vector<8x512xf32>
      %43 = vector.broadcast %41 : vector<1x512xf32> to vector<8x512xf32>
      %44 = arith.mulf %42, %43 : vector<8x512xf32>
      %45 = arith.addf %39, %44 : vector<8x512xf32>
      %c0_14 = arith.constant 0 : index
      %c0_15 = arith.constant 0 : index
      %46 = vector.load %arg7[%c0_14, %c0_15] : memref<8x1xf32, #tpu.memory_space<vmem>>, vector<8x1xf32>
      %cst = arith.constant dense<0.000000e+00> : vector<8xf32>
      %47 = vector.multi_reduction <add>, %45, %cst [1] : vector<8x512xf32> to vector<8xf32>
      %48 = vector.shape_cast %47 : vector<8xf32> to vector<8x1xf32>
      %49 = arith.addf %46, %48 : vector<8x1xf32>
      %c0_16 = arith.constant 0 : index
      %c0_17 = arith.constant 0 : index
      %50 = vector.load %arg7[%c0_16, %c0_17] : memref<8x1xf32, #tpu.memory_space<vmem>>, vector<8x1xf32>
      tpu.vector_store %arg7[%c0_16, %c0_17], %49 {strides = array<i32>} : memref<8x1xf32, #tpu.memory_space<vmem>>, vector<8x1xf32>,
      %c0_18 = arith.constant 0 : index
      %c0_19 = arith.constant 0 : index
      %51 = vector.load %arg8[%c0_18, %c0_19] : memref<8x1xf32, #tpu.memory_space<vmem>>, vector<8x1xf32>
      %52 = arith.mulf %45, %45 : vector<8x512xf32>
      %cst_20 = arith.constant dense<0.000000e+00> : vector<8xf32>
      %53 = vector.multi_reduction <add>, %52, %cst_20 [1] : vector<8x512xf32> to vector<8xf32>
      %54 = vector.shape_cast %53 : vector<8xf32> to vector<8x1xf32>
      %55 = arith.addf %51, %54 : vector<8x1xf32>
      %c0_21 = arith.constant 0 : index
      %c0_22 = arith.constant 0 : index
      %56 = vector.load %arg8[%c0_21, %c0_22] : memref<8x1xf32, #tpu.memory_space<vmem>>, vector<8x1xf32>
      tpu.vector_store %arg8[%c0_21, %c0_22], %55 {strides = array<i32>} : memref<8x1xf32, #tpu.memory_space<vmem>>, vector<8x1xf32>,
      %c1 = arith.constant 1 : index
      %c0_23 = arith.constant 0 : index
      %c0_24 = arith.constant 0 : index
      %57 = vector.load %arg3[%c1, %c0_23, %c0_24] : memref<3x4x512xf32, #tpu.memory_space<vmem>>, vector<1x4x512xf32>
      %58 = vector.shape_cast %57 : vector<1x4x512xf32> to vector<4x512xf32>
      %59 = vector.extract_strided_slice %7 {offsets = [0, 0], sizes = [8, 1], strides = [1, 1]} : vector<8x4xf32> to vector<8x1xf32>
      %60 = vector.extract_strided_slice %58 {offsets = [0, 0], sizes = [1, 512], strides = [1, 1]} : vector<4x512xf32> to vector<1x512xf32>
      %61 = vector.broadcast %59 : vector<8x1xf32> to vector<8x512xf32>
      %62 = vector.broadcast %60 : vector<1x512xf32> to vector<8x512xf32>
      %63 = arith.mulf %61, %62 : vector<8x512xf32>
      %64 = vector.extract_strided_slice %7 {offsets = [0, 1], sizes = [8, 1], strides = [1, 1]} : vector<8x4xf32> to vector<8x1xf32>
      %65 = vector.extract_strided_slice %58 {offsets = [1, 0], sizes = [1, 512], strides = [1, 1]} : vector<4x512xf32> to vector<1x512xf32>
      %66 = vector.broadcast %64 : vector<8x1xf32> to vector<8x512xf32>
      %67 = vector.broadcast %65 : vector<1x512xf32> to vector<8x512xf32>
      %68 = arith.mulf %66, %67 : vector<8x512xf32>
      %69 = arith.addf %63, %68 : vector<8x512xf32>
      %70 = vector.extract_strided_slice %7 {offsets = [0, 2], sizes = [8, 1], strides = [1, 1]} : vector<8x4xf32> to vector<8x1xf32>
      %71 = vector.extract_strided_slice %58 {offsets = [2, 0], sizes = [1, 512], strides = [1, 1]} : vector<4x512xf32> to vector<1x512xf32>
      %72 = vector.broadcast %70 : vector<8x1xf32> to vector<8x512xf32>
      %73 = vector.broadcast %71 : vector<1x512xf32> to vector<8x512xf32>
      %74 = arith.mulf %72, %73 : vector<8x512xf32>
      %75 = arith.addf %69, %74 : vector<8x512xf32>
      %76 = vector.extract_strided_slice %7 {offsets = [0, 3], sizes = [8, 1], strides = [1, 1]} : vector<8x4xf32> to vector<8x1xf32>
      %77 = vector.extract_strided_slice %58 {offsets = [3, 0], sizes = [1, 512], strides = [1, 1]} : vector<4x512xf32> to vector<1x512xf32>
      %78 = vector.broadcast %76 : vector<8x1xf32> to vector<8x512xf32>
      %79 = vector.broadcast %77 : vector<1x512xf32> to vector<8x512xf32>
      %80 = arith.mulf %78, %79 : vector<8x512xf32>
      %81 = arith.addf %75, %80 : vector<8x512xf32>
      %c0_25 = arith.constant 0 : index
      %c0_26 = arith.constant 0 : index
      %82 = vector.load %arg7[%c0_25, %c0_26] : memref<8x1xf32, #tpu.memory_space<vmem>>, vector<8x1xf32>
      %cst_27 = arith.constant dense<0.000000e+00> : vector<8xf32>
      %83 = vector.multi_reduction <add>, %81, %cst_27 [1] : vector<8x512xf32> to vector<8xf32>
      %84 = vector.shape_cast %83 : vector<8xf32> to vector<8x1xf32>
      %85 = arith.addf %82, %84 : vector<8x1xf32>
      %c0_28 = arith.constant 0 : index
      %c0_29 = arith.constant 0 : index
      %86 = vector.load %arg7[%c0_28, %c0_29] : memref<8x1xf32, #tpu.memory_space<vmem>>, vector<8x1xf32>
      tpu.vector_store %arg7[%c0_28, %c0_29], %85 {strides = array<i32>} : memref<8x1xf32, #tpu.memory_space<vmem>>, vector<8x1xf32>,
      %c0_30 = arith.constant 0 : index
      %c0_31 = arith.constant 0 : index
      %87 = vector.load %arg8[%c0_30, %c0_31] : memref<8x1xf32, #tpu.memory_space<vmem>>, vector<8x1xf32>
      %88 = arith.mulf %81, %81 : vector<8x512xf32>
      %cst_32 = arith.constant dense<0.000000e+00> : vector<8xf32>
      %89 = vector.multi_reduction <add>, %88, %cst_32 [1] : vector<8x512xf32> to vector<8xf32>
      %90 = vector.shape_cast %89 : vector<8xf32> to vector<8x1xf32>
      %91 = arith.addf %87, %90 : vector<8x1xf32>
      %c0_33 = arith.constant 0 : index
      %c0_34 = arith.constant 0 : index
      %92 = vector.load %arg8[%c0_33, %c0_34] : memref<8x1xf32, #tpu.memory_space<vmem>>, vector<8x1xf32>
      tpu.vector_store %arg8[%c0_33, %c0_34], %91 {strides = array<i32>} : memref<8x1xf32, #tpu.memory_space<vmem>>, vector<8x1xf32>,
      %c2 = arith.constant 2 : index
      %c0_35 = arith.constant 0 : index
      %c0_36 = arith.constant 0 : index
      %93 = vector.load %arg3[%c2, %c0_35, %c0_36] : memref<3x4x512xf32, #tpu.memory_space<vmem>>, vector<1x4x512xf32>
      %94 = vector.shape_cast %93 : vector<1x4x512xf32> to vector<4x512xf32>
      %95 = vector.extract_strided_slice %7 {offsets = [0, 0], sizes = [8, 1], strides = [1, 1]} : vector<8x4xf32> to vector<8x1xf32>
      %96 = vector.extract_strided_slice %94 {offsets = [0, 0], sizes = [1, 512], strides = [1, 1]} : vector<4x512xf32> to vector<1x512xf32>
      %97 = vector.broadcast %95 : vector<8x1xf32> to vector<8x512xf32>
      %98 = vector.broadcast %96 : vector<1x512xf32> to vector<8x512xf32>
      %99 = arith.mulf %97, %98 : vector<8x512xf32>
      %100 = vector.extract_strided_slice %7 {offsets = [0, 1], sizes = [8, 1], strides = [1, 1]} : vector<8x4xf32> to vector<8x1xf32>
      %101 = vector.extract_strided_slice %94 {offsets = [1, 0], sizes = [1, 512], strides = [1, 1]} : vector<4x512xf32> to vector<1x512xf32>
      %102 = vector.broadcast %100 : vector<8x1xf32> to vector<8x512xf32>
      %103 = vector.broadcast %101 : vector<1x512xf32> to vector<8x512xf32>
      %104 = arith.mulf %102, %103 : vector<8x512xf32>
      %105 = arith.addf %99, %104 : vector<8x512xf32>
      %106 = vector.extract_strided_slice %7 {offsets = [0, 2], sizes = [8, 1], strides = [1, 1]} : vector<8x4xf32> to vector<8x1xf32>
      %107 = vector.extract_strided_slice %94 {offsets = [2, 0], sizes = [1, 512], strides = [1, 1]} : vector<4x512xf32> to vector<1x512xf32>
      %108 = vector.broadcast %106 : vector<8x1xf32> to vector<8x512xf32>
      %109 = vector.broadcast %107 : vector<1x512xf32> to vector<8x512xf32>
      %110 = arith.mulf %108, %109 : vector<8x512xf32>
      %111 = arith.addf %105, %110 : vector<8x512xf32>
      %112 = vector.extract_strided_slice %7 {offsets = [0, 3], sizes = [8, 1], strides = [1, 1]} : vector<8x4xf32> to vector<8x1xf32>
      %113 = vector.extract_strided_slice %94 {offsets = [3, 0], sizes = [1, 512], strides = [1, 1]} : vector<4x512xf32> to vector<1x512xf32>
      %114 = vector.broadcast %112 : vector<8x1xf32> to vector<8x512xf32>
      %115 = vector.broadcast %113 : vector<1x512xf32> to vector<8x512xf32>
      %116 = arith.mulf %114, %115 : vector<8x512xf32>
      %117 = arith.addf %111, %116 : vector<8x512xf32>
      %c0_37 = arith.constant 0 : index
      %c0_38 = arith.constant 0 : index
      %118 = vector.load %arg7[%c0_37, %c0_38] : memref<8x1xf32, #tpu.memory_space<vmem>>, vector<8x1xf32>
      %cst_39 = arith.constant dense<0.000000e+00> : vector<8xf32>
      %119 = vector.multi_reduction <add>, %117, %cst_39 [1] : vector<8x512xf32> to vector<8xf32>
      %120 = vector.shape_cast %119 : vector<8xf32> to vector<8x1xf32>
      %121 = arith.addf %118, %120 : vector<8x1xf32>
      %c0_40 = arith.constant 0 : index
      %c0_41 = arith.constant 0 : index
      %122 = vector.load %arg7[%c0_40, %c0_41] : memref<8x1xf32, #tpu.memory_space<vmem>>, vector<8x1xf32>
      tpu.vector_store %arg7[%c0_40, %c0_41], %121 {strides = array<i32>} : memref<8x1xf32, #tpu.memory_space<vmem>>, vector<8x1xf32>,
      %c0_42 = arith.constant 0 : index
      %c0_43 = arith.constant 0 : index
      %123 = vector.load %arg8[%c0_42, %c0_43] : memref<8x1xf32, #tpu.memory_space<vmem>>, vector<8x1xf32>
      %124 = arith.mulf %117, %117 : vector<8x512xf32>
      %cst_44 = arith.constant dense<0.000000e+00> : vector<8xf32>
      %125 = vector.multi_reduction <add>, %124, %cst_44 [1] : vector<8x512xf32> to vector<8xf32>
      %126 = vector.shape_cast %125 : vector<8xf32> to vector<8x1xf32>
      %127 = arith.addf %123, %126 : vector<8x1xf32>
      %c0_45 = arith.constant 0 : index
      %c0_46 = arith.constant 0 : index
      %128 = vector.load %arg8[%c0_45, %c0_46] : memref<8x1xf32, #tpu.memory_space<vmem>>, vector<8x1xf32>
      tpu.vector_store %arg8[%c0_45, %c0_46], %127 {strides = array<i32>} : memref<8x1xf32, #tpu.memory_space<vmem>>, vector<8x1xf32>,
    } else {
    }
    %c1_i32 = arith.constant 1 : i32
    %11 = arith.cmpi eq, %arg0, %c1_i32 : i32
    %c0_i32_6 = arith.constant 0 : i32
    %12 = arith.cmpi eq, %arg1, %c0_i32_6 : i32
    %13 = arith.andi %11, %12 : i1
    %c0_i32_7 = arith.constant 0 : i32
    %14 = arith.cmpi eq, %arg2, %c0_i32_7 : i32
    %15 = arith.andi %13, %14 : i1
    %16 = arith.extui %15 : i1 to i32
    %c0_i32_8 = arith.constant 0 : i32
    %17 = arith.cmpi ne, %16, %c0_i32_8 : i32
    scf.if %17 {
      %c0_11 = arith.constant 0 : index
      %c0_12 = arith.constant 0 : index
      %21 = vector.load %arg7[%c0_11, %c0_12] : memref<8x1xf32, #tpu.memory_space<vmem>>, vector<8x1xf32>
      %cst = arith.constant 6.51041686E-4 : f32
      %22 = vector.broadcast %cst : f32 to vector<8x1xf32>
      %23 = arith.mulf %21, %22 : vector<8x1xf32>
      %c0_13 = arith.constant 0 : index
      %c0_14 = arith.constant 0 : index
      %24 = vector.load %arg8[%c0_13, %c0_14] : memref<8x1xf32, #tpu.memory_space<vmem>>, vector<8x1xf32>
      %cst_15 = arith.constant 6.51041686E-4 : f32
      %25 = vector.broadcast %cst_15 : f32 to vector<8x1xf32>
      %26 = arith.mulf %24, %25 : vector<8x1xf32>
      %27 = arith.mulf %23, %23 : vector<8x1xf32>
      %28 = arith.subf %26, %27 : vector<8x1xf32>
      %cst_16 = arith.constant 0.000000e+00 : f32
      %29 = vector.broadcast %cst_16 : f32 to vector<8x1xf32>
      %30 = arith.maximumf %28, %29 : vector<8x1xf32>
      %c0_17 = arith.constant 0 : index
      %c0_18 = arith.constant 0 : index
      %31 = vector.load %arg5[%c0_17, %c0_18] : memref<8x2xf32, #tpu.memory_space<vmem>>, vector<8x1xf32>
      %c0_19 = arith.constant 0 : index
      %c1 = arith.constant 1 : index
      %32 = vector.load %arg5[%c0_19, %c1] : memref<8x2xf32, #tpu.memory_space<vmem>>, vector<8x1xf32>
      %cst_20 = arith.constant 9.99999974E-6 : f32
      %33 = vector.broadcast %cst_20 : f32 to vector<8x1xf32>
      %34 = arith.addf %30, %33 : vector<8x1xf32>
      %35 = math.rsqrt %34 : vector<8x1xf32>
      %36 = arith.mulf %31, %35 : vector<8x1xf32>
      %c0_21 = arith.constant 0 : index
      %c0_22 = arith.constant 0 : index
      %37 = vector.load %arg9[%c0_21, %c0_22] : memref<8x1xf32, #tpu.memory_space<vmem>>, vector<8x1xf32>
      tpu.vector_store %arg9[%c0_21, %c0_22], %36 {strides = array<i32>} : memref<8x1xf32, #tpu.memory_space<vmem>>, vector<8x1xf32>,
      %38 = arith.mulf %23, %36 : vector<8x1xf32>
      %39 = arith.subf %32, %38 : vector<8x1xf32>
      %c0_23 = arith.constant 0 : index
      %c0_24 = arith.constant 0 : index
      %40 = vector.load %arg10[%c0_23, %c0_24] : memref<8x1xf32, #tpu.memory_space<vmem>>, vector<8x1xf32>
      tpu.vector_store %arg10[%c0_23, %c0_24], %39 {strides = array<i32>} : memref<8x1xf32, #tpu.memory_space<vmem>>, vector<8x1xf32>,
    } else {
    }
    %c1_i32_9 = arith.constant 1 : i32
    %18 = arith.cmpi eq, %arg0, %c1_i32_9 : i32
    %19 = arith.extui %18 : i1 to i32
    %c0_i32_10 = arith.constant 0 : i32
    %20 = arith.cmpi ne, %19, %c0_i32_10 : i32
    scf.if %20 {
      %c0_11 = arith.constant 0 : index
      %c0_12 = arith.constant 0 : index
      %21 = vector.load %arg9[%c0_11, %c0_12] : memref<8x1xf32, #tpu.memory_space<vmem>>, vector<8x1xf32>
      %c0_13 = arith.constant 0 : index
      %c0_14 = arith.constant 0 : index
      %22 = vector.load %arg10[%c0_13, %c0_14] : memref<8x1xf32, #tpu.memory_space<vmem>>, vector<8x1xf32>
      %c0_15 = arith.constant 0 : index
      %c0_16 = arith.constant 0 : index
      %c0_17 = arith.constant 0 : index
      %23 = vector.load %arg3[%c0_15, %c0_16, %c0_17] : memref<3x4x512xf32, #tpu.memory_space<vmem>>, vector<1x4x512xf32>
      %24 = vector.shape_cast %23 : vector<1x4x512xf32> to vector<4x512xf32>
      %25 = vector.extract_strided_slice %7 {offsets = [0, 0], sizes = [8, 1], strides = [1, 1]} : vector<8x4xf32> to vector<8x1xf32>
      %26 = vector.extract_strided_slice %24 {offsets = [0, 0], sizes = [1, 512], strides = [1, 1]} : vector<4x512xf32> to vector<1x512xf32>
      %27 = vector.broadcast %25 : vector<8x1xf32> to vector<8x512xf32>
      %28 = vector.broadcast %26 : vector<1x512xf32> to vector<8x512xf32>
      %29 = arith.mulf %27, %28 : vector<8x512xf32>
      %30 = vector.extract_strided_slice %7 {offsets = [0, 1], sizes = [8, 1], strides = [1, 1]} : vector<8x4xf32> to vector<8x1xf32>
      %31 = vector.extract_strided_slice %24 {offsets = [1, 0], sizes = [1, 512], strides = [1, 1]} : vector<4x512xf32> to vector<1x512xf32>
      %32 = vector.broadcast %30 : vector<8x1xf32> to vector<8x512xf32>
      %33 = vector.broadcast %31 : vector<1x512xf32> to vector<8x512xf32>
      %34 = arith.mulf %32, %33 : vector<8x512xf32>
      %35 = arith.addf %29, %34 : vector<8x512xf32>
      %36 = vector.extract_strided_slice %7 {offsets = [0, 2], sizes = [8, 1], strides = [1, 1]} : vector<8x4xf32> to vector<8x1xf32>
      %37 = vector.extract_strided_slice %24 {offsets = [2, 0], sizes = [1, 512], strides = [1, 1]} : vector<4x512xf32> to vector<1x512xf32>
      %38 = vector.broadcast %36 : vector<8x1xf32> to vector<8x512xf32>
      %39 = vector.broadcast %37 : vector<1x512xf32> to vector<8x512xf32>
      %40 = arith.mulf %38, %39 : vector<8x512xf32>
      %41 = arith.addf %35, %40 : vector<8x512xf32>
      %42 = vector.extract_strided_slice %7 {offsets = [0, 3], sizes = [8, 1], strides = [1, 1]} : vector<8x4xf32> to vector<8x1xf32>
      %43 = vector.extract_strided_slice %24 {offsets = [3, 0], sizes = [1, 512], strides = [1, 1]} : vector<4x512xf32> to vector<1x512xf32>
      %44 = vector.broadcast %42 : vector<8x1xf32> to vector<8x512xf32>
      %45 = vector.broadcast %43 : vector<1x512xf32> to vector<8x512xf32>
      %46 = arith.mulf %44, %45 : vector<8x512xf32>
      %47 = arith.addf %41, %46 : vector<8x512xf32>
      %48 = vector.broadcast %21 : vector<8x1xf32> to vector<8x512xf32>
      %49 = arith.mulf %47, %48 : vector<8x512xf32>
      %50 = vector.broadcast %22 : vector<8x1xf32> to vector<8x512xf32>
      %51 = arith.addf %49, %50 : vector<8x512xf32>
      %cst = arith.constant 0.000000e+00 : f32
      %52 = vector.broadcast %cst : f32 to vector<8x512xf32>
      %53 = arith.maximumf %51, %52 : vector<8x512xf32>
      %c0_18 = arith.constant 0 : index
      %c0_19 = arith.constant 0 : index
      %c0_20 = arith.constant 0 : index
      %54 = vector.load %arg6[%c0_18, %c0_19, %c0_20] : memref<3x8x512xf32, #tpu.memory_space<vmem>>, vector<1x8x512xf32>
      %55 = vector.shape_cast %54 : vector<1x8x512xf32> to vector<8x512xf32>
      %56 = vector.shape_cast %53 : vector<8x512xf32> to vector<1x8x512xf32>
      tpu.vector_store %arg6[%c0_18, %c0_19, %c0_20], %56 {strides = array<i32>} : memref<3x8x512xf32, #tpu.memory_space<vmem>>, vector<1x8x512xf32>,
      %c1 = arith.constant 1 : index
      %c0_21 = arith.constant 0 : index
      %c0_22 = arith.constant 0 : index
      %57 = vector.load %arg3[%c1, %c0_21, %c0_22] : memref<3x4x512xf32, #tpu.memory_space<vmem>>, vector<1x4x512xf32>
      %58 = vector.shape_cast %57 : vector<1x4x512xf32> to vector<4x512xf32>
      %59 = vector.extract_strided_slice %7 {offsets = [0, 0], sizes = [8, 1], strides = [1, 1]} : vector<8x4xf32> to vector<8x1xf32>
      %60 = vector.extract_strided_slice %58 {offsets = [0, 0], sizes = [1, 512], strides = [1, 1]} : vector<4x512xf32> to vector<1x512xf32>
      %61 = vector.broadcast %59 : vector<8x1xf32> to vector<8x512xf32>
      %62 = vector.broadcast %60 : vector<1x512xf32> to vector<8x512xf32>
      %63 = arith.mulf %61, %62 : vector<8x512xf32>
      %64 = vector.extract_strided_slice %7 {offsets = [0, 1], sizes = [8, 1], strides = [1, 1]} : vector<8x4xf32> to vector<8x1xf32>
      %65 = vector.extract_strided_slice %58 {offsets = [1, 0], sizes = [1, 512], strides = [1, 1]} : vector<4x512xf32> to vector<1x512xf32>
      %66 = vector.broadcast %64 : vector<8x1xf32> to vector<8x512xf32>
      %67 = vector.broadcast %65 : vector<1x512xf32> to vector<8x512xf32>
      %68 = arith.mulf %66, %67 : vector<8x512xf32>
      %69 = arith.addf %63, %68 : vector<8x512xf32>
      %70 = vector.extract_strided_slice %7 {offsets = [0, 2], sizes = [8, 1], strides = [1, 1]} : vector<8x4xf32> to vector<8x1xf32>
      %71 = vector.extract_strided_slice %58 {offsets = [2, 0], sizes = [1, 512], strides = [1, 1]} : vector<4x512xf32> to vector<1x512xf32>
      %72 = vector.broadcast %70 : vector<8x1xf32> to vector<8x512xf32>
      %73 = vector.broadcast %71 : vector<1x512xf32> to vector<8x512xf32>
      %74 = arith.mulf %72, %73 : vector<8x512xf32>
      %75 = arith.addf %69, %74 : vector<8x512xf32>
      %76 = vector.extract_strided_slice %7 {offsets = [0, 3], sizes = [8, 1], strides = [1, 1]} : vector<8x4xf32> to vector<8x1xf32>
      %77 = vector.extract_strided_slice %58 {offsets = [3, 0], sizes = [1, 512], strides = [1, 1]} : vector<4x512xf32> to vector<1x512xf32>
      %78 = vector.broadcast %76 : vector<8x1xf32> to vector<8x512xf32>
      %79 = vector.broadcast %77 : vector<1x512xf32> to vector<8x512xf32>
      %80 = arith.mulf %78, %79 : vector<8x512xf32>
      %81 = arith.addf %75, %80 : vector<8x512xf32>
      %82 = vector.broadcast %21 : vector<8x1xf32> to vector<8x512xf32>
      %83 = arith.mulf %81, %82 : vector<8x512xf32>
      %84 = vector.broadcast %22 : vector<8x1xf32> to vector<8x512xf32>
      %85 = arith.addf %83, %84 : vector<8x512xf32>
      %cst_23 = arith.constant 0.000000e+00 : f32
      %86 = vector.broadcast %cst_23 : f32 to vector<8x512xf32>
      %87 = arith.maximumf %85, %86 : vector<8x512xf32>
      %c1_24 = arith.constant 1 : index
      %c0_25 = arith.constant 0 : index
      %c0_26 = arith.constant 0 : index
      %88 = vector.load %arg6[%c1_24, %c0_25, %c0_26] : memref<3x8x512xf32, #tpu.memory_space<vmem>>, vector<1x8x512xf32>
      %89 = vector.shape_cast %88 : vector<1x8x512xf32> to vector<8x512xf32>
      %90 = vector.shape_cast %87 : vector<8x512xf32> to vector<1x8x512xf32>
      tpu.vector_store %arg6[%c1_24, %c0_25, %c0_26], %90 {strides = array<i32>} : memref<3x8x512xf32, #tpu.memory_space<vmem>>, vector<1x8x512xf32>,
      %c2 = arith.constant 2 : index
      %c0_27 = arith.constant 0 : index
      %c0_28 = arith.constant 0 : index
      %91 = vector.load %arg3[%c2, %c0_27, %c0_28] : memref<3x4x512xf32, #tpu.memory_space<vmem>>, vector<1x4x512xf32>
      %92 = vector.shape_cast %91 : vector<1x4x512xf32> to vector<4x512xf32>
      %93 = vector.extract_strided_slice %7 {offsets = [0, 0], sizes = [8, 1], strides = [1, 1]} : vector<8x4xf32> to vector<8x1xf32>
      %94 = vector.extract_strided_slice %92 {offsets = [0, 0], sizes = [1, 512], strides = [1, 1]} : vector<4x512xf32> to vector<1x512xf32>
      %95 = vector.broadcast %93 : vector<8x1xf32> to vector<8x512xf32>
      %96 = vector.broadcast %94 : vector<1x512xf32> to vector<8x512xf32>
      %97 = arith.mulf %95, %96 : vector<8x512xf32>
      %98 = vector.extract_strided_slice %7 {offsets = [0, 1], sizes = [8, 1], strides = [1, 1]} : vector<8x4xf32> to vector<8x1xf32>
      %99 = vector.extract_strided_slice %92 {offsets = [1, 0], sizes = [1, 512], strides = [1, 1]} : vector<4x512xf32> to vector<1x512xf32>
      %100 = vector.broadcast %98 : vector<8x1xf32> to vector<8x512xf32>
      %101 = vector.broadcast %99 : vector<1x512xf32> to vector<8x512xf32>
      %102 = arith.mulf %100, %101 : vector<8x512xf32>
      %103 = arith.addf %97, %102 : vector<8x512xf32>
      %104 = vector.extract_strided_slice %7 {offsets = [0, 2], sizes = [8, 1], strides = [1, 1]} : vector<8x4xf32> to vector<8x1xf32>
      %105 = vector.extract_strided_slice %92 {offsets = [2, 0], sizes = [1, 512], strides = [1, 1]} : vector<4x512xf32> to vector<1x512xf32>
      %106 = vector.broadcast %104 : vector<8x1xf32> to vector<8x512xf32>
      %107 = vector.broadcast %105 : vector<1x512xf32> to vector<8x512xf32>
      %108 = arith.mulf %106, %107 : vector<8x512xf32>
      %109 = arith.addf %103, %108 : vector<8x512xf32>
      %110 = vector.extract_strided_slice %7 {offsets = [0, 3], sizes = [8, 1], strides = [1, 1]} : vector<8x4xf32> to vector<8x1xf32>
      %111 = vector.extract_strided_slice %92 {offsets = [3, 0], sizes = [1, 512], strides = [1, 1]} : vector<4x512xf32> to vector<1x512xf32>
      %112 = vector.broadcast %110 : vector<8x1xf32> to vector<8x512xf32>
      %113 = vector.broadcast %111 : vector<1x512xf32> to vector<8x512xf32>
      %114 = arith.mulf %112, %113 : vector<8x512xf32>
      %115 = arith.addf %109, %114 : vector<8x512xf32>
      %116 = vector.broadcast %21 : vector<8x1xf32> to vector<8x512xf32>
      %117 = arith.mulf %115, %116 : vector<8x512xf32>
      %118 = vector.broadcast %22 : vector<8x1xf32> to vector<8x512xf32>
      %119 = arith.addf %117, %118 : vector<8x512xf32>
      %cst_29 = arith.constant 0.000000e+00 : f32
      %120 = vector.broadcast %cst_29 : f32 to vector<8x512xf32>
      %121 = arith.maximumf %119, %120 : vector<8x512xf32>
      %c2_30 = arith.constant 2 : index
      %c0_31 = arith.constant 0 : index
      %c0_32 = arith.constant 0 : index
      %122 = vector.load %arg6[%c2_30, %c0_31, %c0_32] : memref<3x8x512xf32, #tpu.memory_space<vmem>>, vector<1x8x512xf32>
      %123 = vector.shape_cast %122 : vector<1x8x512xf32> to vector<8x512xf32>
      %124 = vector.shape_cast %121 : vector<8x512xf32> to vector<1x8x512xf32>
      tpu.vector_store %arg6[%c2_30, %c0_31, %c0_32], %124 {strides = array<i32>} : memref<3x8x512xf32, #tpu.memory_space<vmem>>, vector<1x8x512xf32>,
    } else {
    }
    return
  }
  func.func @transform_0(%arg0: i32, %arg1: i32, %arg2: i32) -> (i32, i32, i32) {
    %c0_i32 = arith.constant 0 : i32
    %c0_i32_0 = arith.constant 0 : i32
    return %arg1, %c0_i32, %arg2 : i32, i32, i32
  }
  func.func @transform_1(%arg0: i32, %arg1: i32, %arg2: i32) -> (i32, i32) {
    %c0_i32 = arith.constant 0 : i32
    %c0_i32_0 = arith.constant 0 : i32
    %c0_i32_1 = arith.constant 0 : i32
    return %c0_i32, %c0_i32_0 : i32, i32
  }
  func.func @transform_2(%arg0: i32, %arg1: i32, %arg2: i32) -> (i32, i32) {
    %c0_i32 = arith.constant 0 : i32
    %c0_i32_0 = arith.constant 0 : i32
    %c0_i32_1 = arith.constant 0 : i32
    return %c0_i32, %c0_i32_0 : i32, i32
  }
  func.func @transform_3(%arg0: i32, %arg1: i32, %arg2: i32) -> (i32, i32, i32) {
    %0 = arith.muli %arg1, %arg0 : i32
    %1 = arith.muli %arg2, %arg0 : i32
    %c0_i32 = arith.constant 0 : i32
    %c0_i32_0 = arith.constant 0 : i32
    return %0, %c0_i32, %1 : i32, i32, i32
  }
}

</mosaic_0001>

<bundles_post_ra>
// kernel: tpu_custom_call.1
= control target key start
LH: loop header
LB: loop body
LE: loop exit
PB: predicated region body
PF: predicated region fallthrough
CT: control target
= control target key end

     0   :  { %8 = vsyncpa [#allocation7], 0  ;;  %s2469_s0 = inlined_call_operand.hbm [shape: f32[3,4,512], index: 0, kind: input, shape index: {}]   ;;  %s2470_s1 = inlined_call_operand.vmem [shape: f32[8,4], index: 1, kind: input, shape index: {}]   ;;  %s2471_s2 = inlined_call_operand.vmem [shape: f32[8,2], index: 2, kind: input, shape index: {}]   ;;  %s2472_s3 = inlined_call_operand.hbm [shape: f32[3,8,512], index: 3, kind: output, shape index: {}]  }
   0x1   :  { %9 = vsyncpa [#allocation8], 0 }
   0x2   :  { %11 = vsyncpa [#allocation8 + $0x1], 0  ;;  %s1801_s12 = smov 0   ;;  %s1803_s13 = smov 0  }
   0x3   :  { %s1805_s14 = smov 0  }
   0x4 LB: > { %s1575_s15 = sadd.s32 4294967295, %s1762_s14   ;;  %s1576_s16 = sadd.s32 4294967294, %s1762_s14   ;;  %s1762_s14 = sphi %s1805_s14, %s17_s14   ;;  %s1758_s13 = sphi %s1803_s13, %s2499_s13   ;;  %s1754_s12 = sphi %s1801_s12, %s2498_s12  }
   0x5   : > { %s36_s17 = sadd.s32 1, %s1758_s13  ;;  %p1577_p0 = scmp.ge.s32.totalorder %s1762_s14, 1 }
   0x6   : > { %p38_p1 = scmp.ge.s32.totalorder %s36_s17, 2  ;;  %p143_p2 = scmp.lt.s32.totalorder %s1762_s14, 3 }
   0x7   : > { %p1823_p3 = scmp.eq.s32.totalorder %s1575_s15, 0  ;;  %s1764_s20 = smov [#allocation6]  }
   0x8   : > { %s2501_s17 = smov (%p38_p1, %s36_s17), 0  ;;  %p1829_p4 = pnand %p1577_p0, %p143_p2 }
   0x9   : > { %s2478_s18 = scalar_select %p1823_p3, 1, 0 }
   0xa   : > { %s2479_s19 = scalar_select %p1829_p4, 1, 0 }
   0xb   : > { %s161_s21 = sshll.u32 %s1764_s20, 4  ;;  %p1611_p5 = pneg %p1829_p4  ;;  %s162_s21 = int_to_ptr.vmem [resolvable:$true] %s161_s21 }
   0xc   : > { %s1678_s25 = scalar_lea.hbm %s2469_s0, 768 }
   0xd   : > { %p1837_p6 = pnand %p1823_p3, %p1611_p5  ;;  %p1679_p7 = scmp.ne.s32.totalorder %s2469_s0, %s1678_s25 }
   0xe   : > { %p1685_p11 = scmp.lt.u32.totalorder %s1678_s25, %s2469_s0 }
   0xf   : > { %p1680_p8 = pneg %p1837_p6 }
  0x11   : > { %p1681_p9 = pnand %p1680_p8, %p1679_p7 }
  0x13   : > { %p1682_p10 = pneg %p1681_p9 }
  0x15   : > { %p1687_p12 = pnand %p1685_p11, %p1682_p10 }
  0x17   : > { %1690 = shalt.err (!%p1687_p12)
}
  0x18   : > { %s1691_s30 = scalar_lea.vmem %s162_s21, 768  ;;  %p1699_p2 = scmp.lt.s32.totalorder %s162_s21, %s162_s21 }
  0x19   : > { %p1692_p13 = scmp.ne.s32.totalorder %s162_s21, %s1691_s30  ;;  %p1700_p5 = scmp.lt.s32.totalorder %s1691_s30, %s1691_s30 }
  0x1b   : > { %p1694_p0 = pnand %p1692_p13, %p1680_p8  ;;  %p1701_p3 = por %p1700_p5, %p1699_p2 }
  0x1d   : > { %p1695_p1 = pneg %p1694_p0 }
  0x1f   : > { %p1702_p4 = pnand %p1701_p3, %p1695_p1 }
  0x21   : > { %1705 = shalt.err (!%p1702_p4)
}
  0x22   : > { %s1765_s4 = smov 256   ;;  %s1766_s5 = smov 16  }
  0x23   : > { %1614 = dma.hbm_to_vmem [thread:$0]  (!%p1837_p6), %s2469_s0, 768, %s162_s21, [#allocation7], %s1765_s4, %s1765_s4, %s1766_s5  }
  0x24   : > { %p2481_p7 = scmp.ne.s32.totalorder %s2479_s19, 0 }
  0x26   : > { %183 = sbr.rel (%p2481_p7) target bundleno = 842 (0x34a), region = 32 }
  0x2d   : > { %p2482_p9 = scmp.ne.s32.totalorder %s2478_s18, 0 }
  0x2f   : > { %1745 = dma.done.wait (%p2482_p9), [#allocation7], 768  }
  0x30   : > { %1747 = vsyncadd (%p2482_p9), [#allocation7], 4294966528  ;;  %p208_p3 = scmp.eq.s32.totalorder %s1754_s12, 0 }
  0x31   : > { %vm217_vm0 = vcmask (%p208_p3), 7168   ;;  %v1767_v0 = vmov (%p208_p3), 0.0  }
  0x32   : > { %216 = sbr.rel (!%p208_p3) target bundleno = 57 (0x39), region = 40  ;;  %218 = vst.msk [vmem:[#allocation2] sm:$0xff] (%p208_p3), %vm217_vm0, %v1767_v0  ;;  %219 = vst.msk [vmem:[#allocation3] sm:$0xff] (%p208_p3), %vm217_vm0, %v1767_v0 }
  0x39 PF: > { %v1867_v1 = vld [vmem:[%s2470_s1] sm:$0xff]  ;;  %p1583_p4 = scmp.ne.s32.totalorder %s1754_s12, 0 }
  0x3a   : > { %2483 = vst [vmem:[#allocation12_spill] sm:$0xff] %v1867_v1 }
  0x3b   : > { %223 = sbr.rel (%p1583_p4) target bundleno = 382 (0x17e), region = 44 }
  0x42   : > { %v1768_v2 = vmov 0   ;;  %v1769_v3 = vmov 2   ;;  %v1770_v4 = vmov 1   ;;  %v1771_v5 = vmov 3   ;;  %v224_v10 = vld [vmem:[#allocation6] sm:$0xff]  ;;  %v225_v11 = vld [vmem:[#allocation6 + $0x8] sm:$0xff] }
  0x43   : > { %1665 = vset.pattern.permute.xlu0 %v1768_v2  ;;  %1667 = vset.pattern.permute.xlu1 %v1769_v3  ;;  %v233_v6 = vlaneseq  ;;  %v439_v42 = vld [vmem:[#allocation6 + $0x10] sm:$0xff]  ;;  %v440_v43 = vld [vmem:[#allocation6 + $0x18] sm:$0xff]  ;;  %vm424_vm1 = vcmask 7168  }
  0x44   : > { %228 = vperm.xlu0 %1665, %v1867_v1   ;;  %322 = vperm.xlu1 %1667, %v1867_v1  }
  0x45   : > { %v234_v7 = vshrl.u32 %v233_v6, 7 }
  0x47   : > { %v1874_v8 = vsub.s32 0, %v234_v7  ;;  %v1876_v9 = vsub.s32 4, %v234_v7  ;;  %v1878_v12 = vsub.s32 1, %v234_v7  ;;  %v1880_v13 = vsub.s32 5, %v234_v7 }
  0x48   : > { %1666 = vset.pattern.permute.xlu0 %v1770_v4  ;;  %1668 = vset.pattern.permute.xlu1 %v1771_v5  ;;  %v1882_v14 = vsub.s32 2, %v234_v7  ;;  %v1884_v15 = vsub.s32 6, %v234_v7  ;;  %v1886_v16 = vsub.s32 3, %v234_v7  ;;  %v1888_v17 = vsub.s32 7, %v234_v7 }
  0x49   : > { %274 = vperm.xlu0 %1666, %v1867_v1   ;;  %370 = vperm.xlu1 %1668, %v1867_v1   ;;  %v236_v18 = vrot.slane %v224_v10, %v1874_v8  ;;  %v240_v19 = vrot.slane %v224_v10, %v1876_v9  ;;  %v244_v20 = vrot.slane %v225_v11, %v1874_v8 }
  0x4a   : > { %v248_v21 = vrot.slane %v225_v11, %v1876_v9  ;;  %v280_v22 = vrot.slane %v224_v10, %v1878_v12  ;;  %v284_v23 = vrot.slane %v224_v10, %v1880_v13  ;;  %v288_v24 = vrot.slane %v225_v11, %v1878_v12 }
  0x4b   : > { %v292_v25 = vrot.slane %v225_v11, %v1880_v13  ;;  %v328_v26 = vrot.slane %v224_v10, %v1882_v14  ;;  %v332_v27 = vrot.slane %v224_v10, %v1884_v15  ;;  %v336_v28 = vrot.slane %v225_v11, %v1882_v14 }
  0x4c   : > { %v340_v29 = vrot.slane %v225_v11, %v1884_v15  ;;  %v376_v30 = vrot.slane %v224_v10, %v1886_v16  ;;  %v380_v31 = vrot.slane %v224_v10, %v1888_v17  ;;  %v384_v32 = vrot.slane %v225_v11, %v1886_v16 }
  0x4d   : > { %1669 = vset.pattern.permute.xlu0 %v1771_v5  ;;  %v388_v33 = vrot.slane %v225_v11, %v1888_v17  ;;  %v1907_v34 = vrot.slane %v236_v18, %v1874_v8  ;;  %v1910_v35 = vrot.slane %v240_v19, %v1874_v8  ;;  %v1913_v36 = vrot.slane %v244_v20, %v1874_v8 }
  0x4e   : > { %v1916_v37 = vrot.slane %v248_v21, %v1874_v8  ;;  %v1919_v38 = vrot.slane %v280_v22, %v1878_v12  ;;  %v1922_v39 = vrot.slane %v284_v23, %v1878_v12  ;;  %v1925_v40 = vrot.slane %v288_v24, %v1878_v12  ;;  %v636_v21 = vld [vmem:[#allocation6 + $0x20] sm:$0xff]  ;;  %v637_v22 = vld [vmem:[#allocation6 + $0x28] sm:$0xff] }
  0x4f   : > { %v1928_v41 = vrot.slane %v292_v25, %v1878_v12  ;;  %v1931_v44 = vrot.slane %v328_v26, %v1882_v14  ;;  %v1934_v45 = vrot.slane %v332_v27, %v1882_v14  ;;  %v1937_v46 = vrot.slane %v336_v28, %v1882_v14 }
  0x50   : > { %v1940_v47 = vrot.slane %v340_v29, %v1882_v14  ;;  %v1943_v48 = vrot.slane %v376_v30, %v1886_v16  ;;  %v1946_v49 = vrot.slane %v380_v31, %v1886_v16  ;;  %v1949_v50 = vrot.slane %v384_v32, %v1886_v16 }
  0x51   : > { %v1952_v51 = vrot.slane %v388_v33, %v1886_v16  ;;  %v446_v52 = vrot.slane %v439_v42, %v1874_v8  ;;  %v450_v53 = vrot.slane %v439_v42, %v1876_v9  ;;  %v454_v54 = vrot.slane %v440_v43, %v1874_v8 }
  0x52   : > { %v458_v55 = vrot.slane %v440_v43, %v1876_v9  ;;  %v486_v56 = vrot.slane %v439_v42, %v1878_v12  ;;  %v490_v57 = vrot.slane %v439_v42, %v1880_v13  ;;  %v494_v58 = vrot.slane %v440_v43, %v1878_v12 }
  0x53   : > { %v498_v59 = vrot.slane %v440_v43, %v1880_v13  ;;  %v530_v60 = vrot.slane %v439_v42, %v1882_v14  ;;  %v534_v61 = vrot.slane %v439_v42, %v1884_v15  ;;  %v538_v62 = vrot.slane %v440_v43, %v1882_v14 }
  0x54   : > { %v542_v63 = vrot.slane %v440_v43, %v1884_v15  ;;  %v574_v0 = vrot.slane %v439_v42, %v1886_v16  ;;  %v578_v2 = vrot.slane %v439_v42, %v1888_v17  ;;  %v582_v3 = vrot.slane %v440_v43, %v1886_v16 }
  0x55   : > { %v586_v4 = vrot.slane %v440_v43, %v1888_v17  ;;  %v466_v5 = vrot.slane %v446_v52, %v1874_v8  ;;  %v470_v6 = vrot.slane %v450_v53, %v1874_v8  ;;  %v474_v7 = vrot.slane %v454_v54, %v1874_v8 }
  0x56   : > { %v478_v10 = vrot.slane %v458_v55, %v1874_v8  ;;  %v1975_v11 = vrot.slane %v486_v56, %v1878_v12  ;;  %v1978_v18 = vrot.slane %v490_v57, %v1878_v12  ;;  %v1981_v19 = vrot.slane %v494_v58, %v1878_v12 }
  0x57   : > { %v1984_v20 = vrot.slane %v498_v59, %v1878_v12  ;;  %v550_v23 = vrot.slane %v530_v60, %v1882_v14  ;;  %v554_v24 = vrot.slane %v534_v61, %v1882_v14  ;;  %v558_v25 = vrot.slane %v538_v62, %v1882_v14 }
  0x58   : > { %v562_v26 = vrot.slane %v542_v63, %v1882_v14  ;;  %v1991_v27 = vrot.slane %v574_v0, %v1886_v16  ;;  %v1994_v28 = vrot.slane %v578_v2, %v1886_v16  ;;  %v1997_v29 = vrot.slane %v582_v3, %v1886_v16 }
  0x59   : > { %v2000_v30 = vrot.slane %v586_v4, %v1886_v16  ;;  %v643_v31 = vrot.slane %v636_v21, %v1874_v8  ;;  %v647_v32 = vrot.slane %v636_v21, %v1876_v9  ;;  %v651_v33 = vrot.slane %v637_v22, %v1874_v8 }
  0x5a   : > { %v655_v42 = vrot.slane %v637_v22, %v1876_v9  ;;  %v683_v43 = vrot.slane %v636_v21, %v1878_v12  ;;  %v687_v52 = vrot.slane %v636_v21, %v1880_v13  ;;  %v691_v53 = vrot.slane %v637_v22, %v1878_v12 }
  0x5b   : > { %v695_v54 = vrot.slane %v637_v22, %v1880_v13  ;;  %v727_v55 = vrot.slane %v636_v21, %v1882_v14  ;;  %v731_v56 = vrot.slane %v636_v21, %v1884_v15  ;;  %v735_v57 = vrot.slane %v637_v22, %v1882_v14 }
  0x5c   : > { %v739_v58 = vrot.slane %v637_v22, %v1884_v15  ;;  %v771_v59 = vrot.slane %v636_v21, %v1886_v16  ;;  %v775_v9 = vrot.slane %v636_v21, %v1888_v17  ;;  %v779_v60 = vrot.slane %v637_v22, %v1886_v16 }
  0x5d   : > { %v783_v61 = vrot.slane %v637_v22, %v1888_v17  ;;  %v663_v62 = vrot.slane %v643_v31, %v1874_v8  ;;  %v667_v13 = vrot.slane %v647_v32, %v1874_v8  ;;  %v671_v63 = vrot.slane %v651_v33, %v1874_v8 }
  0x5e   : > { %v675_v0 = vrot.slane %v655_v42, %v1874_v8  ;;  %v2023_v2 = vrot.slane %v683_v43, %v1878_v12  ;;  %v2026_v15 = vrot.slane %v687_v52, %v1878_v12  ;;  %v2029_v3 = vrot.slane %v691_v53, %v1878_v12 }
  0x5f   : > { %v2032_v4 = vrot.slane %v695_v54, %v1878_v12  ;;  %v2035_v17 = vrot.slane %v727_v55, %v1882_v14  ;;  %v2038_v21 = vrot.slane %v731_v56, %v1882_v14  ;;  %v2041_v8 = vrot.slane %v735_v57, %v1882_v14 }
  0x60   : > { %v2044_v22 = vrot.slane %v739_v58, %v1882_v14  ;;  %v2049_v33 = vrot.slane %v771_v59, %v1886_v16  ;;  %v2052_v12 = vrot.slane %v775_v9, %v1886_v16  ;;  %v2055_v42 = vrot.slane %v779_v60, %v1886_v16 }
  0x61   : > { %v2058_v43 = vrot.slane %v783_v61, %v1886_v16 }
  0x62   : > { %2484 = vst [vmem:[#allocation13_spill] sm:$0xff] %v2052_v12  ;;  %2485 = vst [vmem:[#allocation14_spill] sm:$0xff] %v2055_v42 }
  0x63   : > { %2486 = vst [vmem:[#allocation15_spill] sm:$0xff] %v2058_v43 }
  0xc3   : > { %v229_v31 = vpop.permute.xlu0 %228  ;;  %v2046_v32 = vpop.permute.xlu1 %322 }
  0xc4   : > { %v269_v52 = vmul.f32 %v1907_v34, %v229_v31  ;;  %v270_v14 = vmul.f32 %v1910_v35, %v229_v31  ;;  %v271_v53 = vmul.f32 %v1913_v36, %v229_v31  ;;  %v272_v54 = vmul.f32 %v1916_v37, %v229_v31 }
  0xc5   : > { %v361_v55 = vmul.f32 %v1931_v44, %v2046_v32  ;;  %v362_v56 = vmul.f32 %v1934_v45, %v2046_v32  ;;  %v363_v57 = vmul.f32 %v1937_v46, %v2046_v32  ;;  %v364_v16 = vmul.f32 %v1940_v47, %v2046_v32 }
  0xc6   : > { %v479_v58 = vmul.f32 %v466_v5, %v229_v31  ;;  %v480_v34 = vmul.f32 %v470_v6, %v229_v31  ;;  %v481_v59 = vmul.f32 %v474_v7, %v229_v31  ;;  %v482_v35 = vmul.f32 %v478_v10, %v229_v31 }
  0xc7   : > { %v563_v36 = vmul.f32 %v550_v23, %v2046_v32  ;;  %v564_v37 = vmul.f32 %v554_v24, %v2046_v32  ;;  %v565_v9 = vmul.f32 %v558_v25, %v2046_v32  ;;  %v566_v44 = vmul.f32 %v562_v26, %v2046_v32 }
  0xc8   : > { %v2076_v60 = vpop.permute.xlu0 %274  ;;  %v2078_v45 = vpop.permute.xlu1 %370  ;;  %v2080_v46 = vmul.f32 %v663_v62, %v229_v31  ;;  %v2082_v61 = vmul.f32 %v667_v13, %v229_v31  ;;  %v2084_v47 = vmul.f32 %v671_v63, %v229_v31  ;;  %v2086_v5 = vmul.f32 %v675_v0, %v229_v31 }
  0xc9   : > { %v313_v6 = vmul.f32 %v1919_v38, %v2076_v60  ;;  %v314_v7 = vmul.f32 %v1922_v39, %v2076_v60  ;;  %v315_v10 = vmul.f32 %v1925_v40, %v2076_v60  ;;  %v316_v23 = vmul.f32 %v1928_v41, %v2076_v60 }
  0xca   : > { %v409_v24 = vmul.f32 %v1943_v48, %v2078_v45  ;;  %v410_v25 = vmul.f32 %v1946_v49, %v2078_v45  ;;  %v411_v26 = vmul.f32 %v1949_v50, %v2078_v45  ;;  %v412_v38 = vmul.f32 %v1952_v51, %v2078_v45 }
  0xcb   : > { %v317_v62 = vadd.f32 %v313_v6, %v269_v52  ;;  %v318_v39 = vadd.f32 %v314_v7, %v270_v14  ;;  %v319_v13 = vadd.f32 %v315_v10, %v271_v53  ;;  %v320_v63 = vadd.f32 %v316_v23, %v272_v54 }
  0xcc   : > { %v519_v40 = vmul.f32 %v1975_v11, %v2076_v60  ;;  %v520_v41 = vmul.f32 %v1978_v18, %v2076_v60  ;;  %v521_v48 = vmul.f32 %v1981_v19, %v2076_v60  ;;  %v522_v49 = vmul.f32 %v1984_v20, %v2076_v60 }
  0xcd   : > { %v365_v50 = vadd.f32 %v361_v55, %v317_v62  ;;  %v366_v0 = vadd.f32 %v362_v56, %v318_v39  ;;  %v367_v31 = vadd.f32 %v363_v57, %v319_v13  ;;  %v368_v51 = vadd.f32 %v364_v16, %v320_v63 }
  0xce   : > { %v523_v52 = vadd.f32 %v519_v40, %v479_v58  ;;  %v524_v14 = vadd.f32 %v520_v41, %v480_v34  ;;  %v525_v53 = vadd.f32 %v521_v48, %v481_v59  ;;  %v526_v54 = vadd.f32 %v522_v49, %v482_v35  ;;  %v2487_v48 = vld [vmem:[#allocation13_spill] sm:$0xff] }
  0xcf   : > { %v413_v6 = vadd.f32 %v409_v24, %v365_v50  ;;  %v414_v7 = vadd.f32 %v410_v25, %v366_v0  ;;  %v415_v11 = vadd.f32 %v411_v26, %v367_v31  ;;  %v416_v10 = vadd.f32 %v412_v38, %v368_v51 }
  0xd0   : > { %v567_v23 = vadd.f32 %v563_v36, %v523_v52  ;;  %v568_v18 = vadd.f32 %v564_v37, %v524_v14  ;;  %v569_v1 = vadd.f32 %v565_v9, %v525_v53  ;;  %v570_v43 = vadd.f32 %v566_v44, %v526_v54 }
  0xd1   : > { %v418_v19 = vadd.f32 %v414_v7, %v413_v6  ;;  %v427_v42 = vmul.f32 %v413_v6, %v413_v6  ;;  %v428_v12 = vmul.f32 %v414_v7, %v414_v7  ;;  %v429_v20 = vmul.f32 %v415_v11, %v415_v11 }
  0xd2   : > { %v430_v55 = vmul.f32 %v416_v10, %v416_v10  ;;  %v607_v56 = vmul.f32 %v1991_v27, %v2078_v45  ;;  %v608_v57 = vmul.f32 %v1994_v28, %v2078_v45  ;;  %v609_v16 = vmul.f32 %v1997_v29, %v2078_v45 }
  0xd3   : > { %v419_v58 = vadd.f32 %v418_v19, %v415_v11  ;;  %v431_v34 = vadd.f32 %v428_v12, %v427_v42  ;;  %v610_v59 = vmul.f32 %v2000_v30, %v2078_v45  ;;  %v716_v35 = vmul.f32 %v2023_v2, %v2076_v60  ;;  %v417_v19 = vld [vmem:[#allocation2] sm:$0xff] }
  0xd4   : > { %v611_v36 = vadd.f32 %v607_v56, %v567_v23  ;;  %v612_v37 = vadd.f32 %v608_v57, %v568_v18  ;;  %v613_v9 = vadd.f32 %v609_v16, %v569_v1  ;;  %v717_v27 = vmul.f32 %v2026_v15, %v2076_v60 }
  0xd5   : > { %v420_v44 = vadd.f32 %v419_v58, %v416_v10  ;;  %v432_v24 = vadd.f32 %v431_v34, %v429_v20  ;;  %v614_v28 = vadd.f32 %v610_v59, %v570_v43  ;;  %v718_v29 = vmul.f32 %v2029_v3, %v2076_v60  ;;  %v426_v20 = vld [vmem:[#allocation3] sm:$0xff] }
  0xd6   : > { %v624_v25 = vmul.f32 %v611_v36, %v611_v36  ;;  %v625_v12 = vmul.f32 %v612_v37, %v612_v37  ;;  %v626_v42 = vmul.f32 %v613_v9, %v613_v9  ;;  %v616_v26 = vadd.f32 %v612_v37, %v611_v36 }
  0xd7   : > { %421 = vadd.xlane.f32.xlu1 %v420_v44  ;;  %v433_v30 = vadd.f32 %v432_v24, %v430_v55  ;;  %v627_v38 = vmul.f32 %v614_v28, %v614_v28  ;;  %v719_v2 = vmul.f32 %v2032_v4, %v2076_v60  ;;  %v720_v1 = vadd.f32 %v716_v35, %v2080_v46 }
  0xd8   : > { %v628_v62 = vadd.f32 %v625_v12, %v624_v25  ;;  %v617_v15 = vadd.f32 %v616_v26, %v613_v9  ;;  %v721_v39 = vadd.f32 %v717_v27, %v2082_v61  ;;  %v722_v43 = vadd.f32 %v718_v29, %v2084_v47 }
  0xd9   : > { %434 = vadd.xlane.f32.xlu0 %v433_v30  ;;  %v723_v3 = vadd.f32 %v719_v2, %v2086_v5  ;;  %v760_v13 = vmul.f32 %v2035_v17, %v2046_v32  ;;  %v761_v63 = vmul.f32 %v2038_v21, %v2046_v32  ;;  %v762_v4 = vmul.f32 %v2041_v8, %v2046_v32  ;;  %v2488_v21 = vld [vmem:[#allocation14_spill] sm:$0xff]  ;;  %v2489_v8 = vld [vmem:[#allocation15_spill] sm:$0xff] }
  0xda   : > { %v629_v60 = vadd.f32 %v628_v62, %v626_v42  ;;  %v618_v46 = vadd.f32 %v617_v15, %v614_v28  ;;  %v763_v40 = vmul.f32 %v2044_v22, %v2046_v32  ;;  %v804_v61 = vmul.f32 %v2049_v33, %v2078_v45 }
  0xdb   : > { %v764_v47 = vadd.f32 %v760_v13, %v720_v1  ;;  %v765_v41 = vadd.f32 %v761_v63, %v721_v39  ;;  %v766_v5 = vadd.f32 %v762_v4, %v722_v43  ;;  %v805_v17 = vmul.f32 %v2487_v48, %v2078_v45 }
  0xdc   : > { %v630_v49 = vadd.f32 %v629_v60, %v627_v38  ;;  %v767_v50 = vadd.f32 %v763_v40, %v723_v3  ;;  %v806_v0 = vmul.f32 %v2488_v21, %v2078_v45  ;;  %v807_v31 = vmul.f32 %v2489_v8, %v2078_v45 }
  0xdd   : > { %619 = vadd.xlane.f32.xlu0 %v618_v46  ;;  %v808_v51 = vadd.f32 %v804_v61, %v764_v47  ;;  %v809_v22 = vadd.f32 %v805_v17, %v765_v41 }
  0xde   : > { %631 = vadd.xlane.f32.xlu1 %v630_v49  ;;  %v810_v32 = vadd.f32 %v806_v0, %v766_v5  ;;  %v811_v33 = vadd.f32 %v807_v31, %v767_v50 }
  0xdf   : > { %v821_v52 = vmul.f32 %v808_v51, %v808_v51  ;;  %v822_v14 = vmul.f32 %v809_v22, %v809_v22  ;;  %v813_v53 = vadd.f32 %v809_v22, %v808_v51 }
  0xe0   : > { %v823_v54 = vmul.f32 %v810_v32, %v810_v32  ;;  %v824_v11 = vmul.f32 %v811_v33, %v811_v33 }
  0xe1   : > { %v825_v6 = vadd.f32 %v822_v14, %v821_v52  ;;  %v814_v7 = vadd.f32 %v813_v53, %v810_v32 }
  0xe3   : > { %v826_v10 = vadd.f32 %v825_v6, %v823_v54  ;;  %v815_v23 = vadd.f32 %v814_v7, %v811_v33 }
  0xe5   : > { %v827_v18 = vadd.f32 %v826_v10, %v824_v11  ;;  %816 = vadd.xlane.f32.xlu0 %v815_v23 }
  0xe7   : > { %828 = vadd.xlane.f32.xlu1 %v827_v18 }
 0x164   : > { %v422_v45 = vpop.xlane.xlu1 %421 }
 0x165   : > { %v423_v55 = vadd.f32 %v422_v45, %v417_v19 }
 0x166   : > { %v435_v56 = vpop.xlane.xlu0 %434 }
 0x167   : > { %425 = vst.msk [vmem:[#allocation2] sm:$0xff] %vm424_vm1, %v423_v55  ;;  %v436_v57 = vadd.f32 %v435_v56, %v426_v20 }
 0x169   : > { %437 = vst.msk [vmem:[#allocation3] sm:$0xff] %vm424_vm1, %v436_v57 }
 0x16a   : > { %v620_v16 = vpop.xlane.xlu0 %619 }
 0x16b   : > { %v632_v35 = vpop.xlane.xlu1 %631 }
 0x16e   : > { %v615_v58 = vld [vmem:[#allocation2] sm:$0xff] }
 0x16f   : > { %v621_v34 = vadd.f32 %v620_v16, %v615_v58 }
 0x170   : > { %v623_v59 = vld [vmem:[#allocation3] sm:$0xff] }
 0x171   : > { %v633_v36 = vadd.f32 %v632_v35, %v623_v59  ;;  %622 = vst.msk [vmem:[#allocation2] sm:$0xff] %vm424_vm1, %v621_v34 }
 0x172   : > { %v817_v37 = vpop.xlane.xlu0 %816 }
 0x173   : > { %634 = vst.msk [vmem:[#allocation3] sm:$0xff] %vm424_vm1, %v633_v36 }
 0x174   : > { %v829_v24 = vpop.xlane.xlu1 %828 }
 0x178   : > { %v812_v9 = vld [vmem:[#allocation2] sm:$0xff] }
 0x179   : > { %v818_v27 = vadd.f32 %v817_v37, %v812_v9 }
 0x17a   : > { %v820_v44 = vld [vmem:[#allocation3] sm:$0xff] }
 0x17b   : > { %v830_v28 = vadd.f32 %v829_v24, %v820_v44  ;;  %819 = vst.msk [vmem:[#allocation2] sm:$0xff] %vm424_vm1, %v818_v27 }
 0x17d   : > { %831 = vst.msk [vmem:[#allocation3] sm:$0xff] %vm424_vm1, %v830_v28 }
 0x17e PF: > { %p832_p6 = scmp.eq.s32.totalorder %s1754_s12, 1 }
 0x17f   : > { %v846_v1 = vld [vmem:[%s2471_s2] sm:$0xff] (%p832_p6)  ;;  %vm850_vm2 = vcmask (%p832_p6), 7168   ;;  %s1772_s18 = smov (%p832_p6), 1   ;;  %s1773_s19 = smov (%p832_p6), 127  }
 0x180   : > { %838 = sbr.rel (!%p832_p6) target bundleno = 645 (0x285), region = 48 }
 0x182   : > { %v839_v29 = vld [vmem:[#allocation2] sm:$0xff] (%p832_p6) }
 0x183   : > { %v840_v12 = vmul.f32 (%p832_p6), 0.0006510417, %v839_v29 }
 0x184   : > { %v841_v25 = vld [vmem:[#allocation3] sm:$0xff] (%p832_p6) }
 0x185   : > { %v842_v42 = vmul.f32 (%p832_p6), 0.0006510417, %v841_v25  ;;  %v843_v26 = vmul.f32 (%p832_p6), %v840_v12, %v840_v12 }
 0x187   : > { %v844_v30 = vsub.f32 %v842_v42, %v843_v26 }
 0x189   : > { %v845_v38 = vmax.f32 %v844_v30, 0.0 }
 0x18b   : > { %v847_v2 = vadd.f32 1e-05, %v845_v38 }
 0x18d   : > { %1670 = vrsqrt.f32 %v847_v2 }
 0x197   : > { %v1671_v62 = vpop.eup %1670 }
 0x198   : > { %v849_v15 = vmul.f32 %v1671_v62, %v846_v1 }
 0x19a   : > { %v852_v39 = vmul.f32 %v849_v15, %v840_v12  ;;  %851 = vst.msk [vmem:[#allocation4] sm:$0xff] %vm850_vm2, %v849_v15 }
 0x19c   : > { %854 = vrot.lane.b32.xlu0 %v852_v39, %s1772_s18 }
 0x20e   : > { %v855_v43 = vpop.permute.xlu0 %854 }
 0x20f   : > { %v857_v3 = vsub.f32 %v846_v1, %v855_v43 }
 0x211   : > { %859 = vrot.lane.b32.xlu0 %v857_v3, %s1773_s19 }
 0x283   : > { %v860_v13 = vpop.permute.xlu0 %859 }
 0x284   : > { %862 = vst.msk [vmem:[#allocation5] sm:$0xff] %vm850_vm2, %v860_v13 }
 0x285 PF: > { %p1586_p8 = scmp.ne.s32.totalorder %s1754_s12, 1 }
 0x287   : > { %865 = sbr.rel (%p1586_p8) target bundleno = 818 (0x332), region = 52 }
 0x28e   : > { %v1774_v63 = vmov 0   ;;  %v1775_v4 = vmov 2   ;;  %v2490_v60 = vld [vmem:[#allocation12_spill] sm:$0xff]  ;;  %v1776_v46 = vmov 1   ;;  %v1777_v40 = vmov 3   ;;  %v867_v47 = vld [vmem:[#allocation5] sm:$0xff] }
 0x28f   : > { %1672 = vset.pattern.permute.xlu0 %v1774_v63  ;;  %1674 = vset.pattern.permute.xlu1 %v1775_v4  ;;  %v866_v61 = vld [vmem:[#allocation4] sm:$0xff]  ;;  %v877_v41 = vlaneseq  ;;  %v2165_v50 = vld [vmem:[#allocation6 + $0x18] sm:$0xff]  ;;  %v2171_v8 = vld [vmem:[#allocation6 + $0x20] sm:$0xff] }
 0x290   : > { %872 = vperm.xlu0 %1672, %v2490_v60   ;;  %966 = vperm.xlu1 %1674, %v2490_v60   ;;  %v2163_v49 = vld [vmem:[#allocation6 + $0x10] sm:$0xff]  ;;  %v2173_v31 = vld [vmem:[#allocation6 + $0x28] sm:$0xff]  ;;  %v2178_v32 = vld [vmem:[#allocation6] sm:$0xff] }
 0x291   : > { %v878_v5 = vshrl.u32 %v877_v41, 7  ;;  %v2180_v33 = vld [vmem:[#allocation6 + $0x8] sm:$0xff] }
 0x293   : > { %v879_v48 = vsub.s32 0, %v878_v5  ;;  %v883_v17 = vsub.s32 4, %v878_v5  ;;  %v2167_v21 = vsub.s32 1, %v878_v5  ;;  %v2169_v0 = vsub.s32 2, %v878_v5 }
 0x294   : > { %1673 = vset.pattern.permute.xlu0 %v1776_v46  ;;  %1675 = vset.pattern.permute.xlu1 %v1777_v40  ;;  %v2175_v51 = vsub.s32 3, %v878_v5  ;;  %v927_v52 = vsub.s32 5, %v878_v5  ;;  %v2182_v14 = vsub.s32 6, %v878_v5  ;;  %v2187_v7 = vsub.s32 7, %v878_v5 }
 0x295   : > { %918 = vperm.xlu0 %1673, %v2490_v60   ;;  %1014 = vperm.xlu1 %1675, %v2490_v60   ;;  %v1095_v22 = vrot.slane %v2163_v49, %v879_v48  ;;  %v1099_v53 = vrot.slane %v2163_v49, %v883_v17  ;;  %v1103_v54 = vrot.slane %v2165_v50, %v879_v48 }
 0x296   : > { %v1107_v6 = vrot.slane %v2165_v50, %v883_v17  ;;  %v1289_v11 = vrot.slane %v2171_v8, %v879_v48  ;;  %v1293_v10 = vrot.slane %v2171_v8, %v883_v17  ;;  %v1297_v23 = vrot.slane %v2173_v31, %v879_v48 }
 0x297   : > { %v1301_v18 = vrot.slane %v2173_v31, %v883_v17  ;;  %v880_v19 = vrot.slane %v2178_v32, %v879_v48  ;;  %v884_v45 = vrot.slane %v2178_v32, %v883_v17  ;;  %v888_v20 = vrot.slane %v2180_v33, %v879_v48 }
 0x298   : > { %v892_v55 = vrot.slane %v2180_v33, %v883_v17  ;;  %v2197_v56 = vrot.slane %v1095_v22, %v879_v48  ;;  %v1135_v57 = vrot.slane %v2163_v49, %v2167_v21  ;;  %v1139_v16 = vrot.slane %v2163_v49, %v927_v52 }
 0x299   : > { %1676 = vset.pattern.permute.xlu1 %v1774_v63  ;;  %1677 = vset.pattern.permute.xlu0 %v1774_v63  ;;  %v1143_v58 = vrot.slane %v2165_v50, %v2167_v21  ;;  %v2204_v34 = vrot.slane %v1099_v53, %v879_v48  ;;  %v2206_v59 = vrot.slane %v1103_v54, %v879_v48 }
 0x29a   : > { %1063 = vperm.xlu1 %1676, %v866_v61   ;;  %1072 = vperm.xlu0 %1677, %v867_v47   ;;  %v2208_v35 = vrot.slane %v1107_v6, %v879_v48  ;;  %v1147_v36 = vrot.slane %v2165_v50, %v927_v52  ;;  %v2211_v37 = vrot.slane %v1289_v11, %v879_v48 }
 0x29b   : > { %v2213_v9 = vrot.slane %v1293_v10, %v879_v48  ;;  %v2215_v27 = vrot.slane %v1297_v23, %v879_v48  ;;  %v2217_v44 = vrot.slane %v1301_v18, %v879_v48  ;;  %v2219_v24 = vrot.slane %v880_v19, %v879_v48 }
 0x29c   : > { %v2221_v28 = vrot.slane %v884_v45, %v879_v48  ;;  %v2223_v29 = vrot.slane %v888_v20, %v879_v48  ;;  %v2225_v25 = vrot.slane %v892_v55, %v879_v48  ;;  %v2228_v12 = vrot.slane %v1135_v57, %v2167_v21 }
 0x29d   : > { %v2231_v42 = vrot.slane %v1139_v16, %v2167_v21  ;;  %v2234_v26 = vrot.slane %v1143_v58, %v2167_v21  ;;  %v1329_v30 = vrot.slane %v2171_v8, %v2167_v21  ;;  %v2239_v38 = vrot.slane %v1147_v36, %v2167_v21 }
 0x29e   : > { %v1333_v2 = vrot.slane %v2171_v8, %v927_v52  ;;  %v1337_v1 = vrot.slane %v2173_v31, %v2167_v21  ;;  %v1341_v62 = vrot.slane %v2173_v31, %v927_v52  ;;  %v924_v15 = vrot.slane %v2178_v32, %v2167_v21 }
 0x29f   : > { %v928_v39 = vrot.slane %v2178_v32, %v927_v52  ;;  %v932_v43 = vrot.slane %v2180_v33, %v2167_v21  ;;  %v936_v3 = vrot.slane %v2180_v33, %v927_v52  ;;  %v972_v13 = vrot.slane %v2178_v32, %v2169_v0 }
 0x2a0   : > { %v976_v63 = vrot.slane %v2178_v32, %v2182_v14  ;;  %v980_v4 = vrot.slane %v2180_v33, %v2169_v0  ;;  %v984_v60 = vrot.slane %v2180_v33, %v2182_v14  ;;  %v2260_v46 = vrot.slane %v1329_v30, %v2167_v21 }
 0x2a1   : > { %v1020_v40 = vrot.slane %v2178_v32, %v2175_v51  ;;  %v1024_v61 = vrot.slane %v2178_v32, %v2187_v7  ;;  %v1028_v47 = vrot.slane %v2180_v33, %v2175_v51  ;;  %v2269_v41 = vrot.slane %v1333_v2, %v2167_v21 }
 0x2a2   : > { %v2272_v5 = vrot.slane %v1337_v1, %v2167_v21  ;;  %v2275_v48 = vrot.slane %v1341_v62, %v2167_v21  ;;  %v1032_v17 = vrot.slane %v2180_v33, %v2187_v7  ;;  %v2280_v22 = vrot.slane %v924_v15, %v2167_v21 }
 0x2a3   : > { %v2283_v32 = vrot.slane %v928_v39, %v2167_v21  ;;  %v2286_v52 = vrot.slane %v932_v43, %v2167_v21  ;;  %v2289_v53 = vrot.slane %v936_v3, %v2167_v21  ;;  %v992_v54 = vrot.slane %v972_v13, %v2169_v0 }
 0x2a4   : > { %v996_v6 = vrot.slane %v976_v63, %v2169_v0  ;;  %v1000_v11 = vrot.slane %v980_v4, %v2169_v0  ;;  %v1004_v33 = vrot.slane %v984_v60, %v2169_v0  ;;  %v2296_v10 = vrot.slane %v1020_v40, %v2175_v51 }
 0x2a5   : > { %v2299_v23 = vrot.slane %v1024_v61, %v2175_v51  ;;  %v2302_v18 = vrot.slane %v1028_v47, %v2175_v51  ;;  %v1179_v21 = vrot.slane %v2163_v49, %v2169_v0  ;;  %v2307_v19 = vrot.slane %v1032_v17, %v2175_v51 }
 0x2a6   : > { %v1183_v45 = vrot.slane %v2163_v49, %v2182_v14  ;;  %v1187_v20 = vrot.slane %v2165_v50, %v2169_v0  ;;  %v1191_v55 = vrot.slane %v2165_v50, %v2182_v14  ;;  %v1223_v57 = vrot.slane %v2163_v49, %v2175_v51 }
 0x2a7   : > { %v1227_v16 = vrot.slane %v2163_v49, %v2187_v7  ;;  %v1231_v58 = vrot.slane %v2165_v50, %v2175_v51  ;;  %v1235_v36 = vrot.slane %v2165_v50, %v2187_v7  ;;  %v1373_v30 = vrot.slane %v2171_v8, %v2169_v0 }
 0x2a8   : > { %v1377_v2 = vrot.slane %v2171_v8, %v2182_v14  ;;  %v1381_v1 = vrot.slane %v2173_v31, %v2169_v0  ;;  %v1385_v62 = vrot.slane %v2173_v31, %v2182_v14  ;;  %v1417_v49 = vrot.slane %v2171_v8, %v2175_v51 }
 0x2a9   : > { %v1421_v15 = vrot.slane %v2171_v8, %v2187_v7  ;;  %v1425_v50 = vrot.slane %v2173_v31, %v2175_v51  ;;  %v1429_v39 = vrot.slane %v2173_v31, %v2187_v7  ;;  %v1199_v43 = vrot.slane %v1179_v21, %v2169_v0 }
 0x2aa   : > { %v1203_v3 = vrot.slane %v1183_v45, %v2169_v0  ;;  %v1207_v13 = vrot.slane %v1187_v20, %v2169_v0  ;;  %v1211_v14 = vrot.slane %v1191_v55, %v2169_v0  ;;  %v2344_v63 = vrot.slane %v1223_v57, %v2175_v51 }
 0x2ab   : > { %v2347_v4 = vrot.slane %v1227_v16, %v2175_v51  ;;  %v2350_v8 = vrot.slane %v1231_v58, %v2175_v51  ;;  %v2353_v60 = vrot.slane %v1235_v36, %v2175_v51  ;;  %v2356_v31 = vrot.slane %v1373_v30, %v2169_v0 }
 0x2ac   : > { %v2359_v7 = vrot.slane %v1377_v2, %v2169_v0  ;;  %v2362_v40 = vrot.slane %v1381_v1, %v2169_v0  ;;  %v2365_v61 = vrot.slane %v1385_v62, %v2169_v0  ;;  %v2368_v17 = vrot.slane %v1417_v49, %v2175_v51 }
 0x2ad   : > { %v2371_v21 = vrot.slane %v1421_v15, %v2175_v51  ;;  %v2374_v45 = vrot.slane %v1425_v50, %v2175_v51  ;;  %v2377_v20 = vrot.slane %v1429_v39, %v2175_v51 }
 0x2af   : > { %2491 = vst [vmem:[#allocation16_spill] sm:$0xff] %v2371_v21  ;;  %2492 = vst [vmem:[#allocation17_spill] sm:$0xff] %v2374_v45 }
 0x2b0   : > { %2493 = vst [vmem:[#allocation18_spill] sm:$0xff] %v2377_v20 }
 0x30f   : > { %v873_v47 = vpop.permute.xlu0 %872  ;;  %v2383_v58 = vpop.permute.xlu1 %966 }
 0x310   : > { %v913_v55 = vmul.f32 %v2219_v24, %v873_v47  ;;  %v914_v57 = vmul.f32 %v2221_v28, %v873_v47  ;;  %v915_v0 = vmul.f32 %v2223_v29, %v873_v47  ;;  %v916_v16 = vmul.f32 %v2225_v25, %v873_v47 }
 0x311   : > { %v1128_v36 = vmul.f32 %v2197_v56, %v873_v47  ;;  %v1129_v30 = vmul.f32 %v2204_v34, %v873_v47  ;;  %v1130_v2 = vmul.f32 %v2206_v59, %v873_v47  ;;  %v1131_v1 = vmul.f32 %v2208_v35, %v873_v47 }
 0x312   : > { %v1322_v51 = vmul.f32 %v2211_v37, %v873_v47  ;;  %v1323_v24 = vmul.f32 %v2213_v9, %v873_v47  ;;  %v1324_v28 = vmul.f32 %v2215_v27, %v873_v47  ;;  %v1325_v29 = vmul.f32 %v2217_v44, %v873_v47 }
 0x313   : > { %v1005_v25 = vmul.f32 %v992_v54, %v2383_v58  ;;  %v1006_v62 = vmul.f32 %v996_v6, %v2383_v58  ;;  %v1007_v56 = vmul.f32 %v1000_v11, %v2383_v58  ;;  %v1008_v34 = vmul.f32 %v1004_v33, %v2383_v58 }
 0x314   : > { %v919_v49 = vpop.permute.xlu0 %918  ;;  %v1212_v59 = vmul.f32 %v1199_v43, %v2383_v58  ;;  %v1213_v35 = vmul.f32 %v1203_v3, %v2383_v58  ;;  %v1214_v37 = vmul.f32 %v1207_v13, %v2383_v58  ;;  %v1215_v9 = vmul.f32 %v1211_v14, %v2383_v58  ;;  %v1015_v39 = vpop.permute.xlu1 %1014 }
 0x315   : > { %v957_v27 = vmul.f32 %v2280_v22, %v919_v49  ;;  %v958_v44 = vmul.f32 %v2283_v32, %v919_v49  ;;  %v959_v54 = vmul.f32 %v2286_v52, %v919_v49  ;;  %v960_v6 = vmul.f32 %v2289_v53, %v919_v49 }
 0x316   : > { %v1168_v11 = vmul.f32 %v2228_v12, %v919_v49  ;;  %v1169_v33 = vmul.f32 %v2231_v42, %v919_v49  ;;  %v1170_v15 = vmul.f32 %v2234_v26, %v919_v49  ;;  %v1171_v50 = vmul.f32 %v2239_v38, %v919_v49 }
 0x317   : > { %v1362_v43 = vmul.f32 %v2260_v46, %v919_v49  ;;  %v1363_v3 = vmul.f32 %v2269_v41, %v919_v49  ;;  %v1364_v22 = vmul.f32 %v2272_v5, %v919_v49  ;;  %v1365_v32 = vmul.f32 %v2275_v48, %v919_v49 }
 0x318   : > { %v961_v52 = vadd.f32 %v957_v27, %v913_v55  ;;  %v962_v13 = vadd.f32 %v958_v44, %v914_v57  ;;  %v963_v53 = vadd.f32 %v959_v54, %v915_v0  ;;  %v964_v14 = vadd.f32 %v960_v6, %v916_v16 }
 0x319   : > { %v1053_v12 = vmul.f32 %v2296_v10, %v1015_v39  ;;  %v1054_v42 = vmul.f32 %v2299_v23, %v1015_v39  ;;  %v1055_v26 = vmul.f32 %v2302_v18, %v1015_v39  ;;  %v1056_v38 = vmul.f32 %v2307_v19, %v1015_v39 }
 0x31a   : > { %v1009_v47 = vadd.f32 %v1005_v25, %v961_v52  ;;  %v1010_v46 = vadd.f32 %v1006_v62, %v962_v13  ;;  %v1011_v20 = vadd.f32 %v1007_v56, %v963_v53  ;;  %v1012_v41 = vadd.f32 %v1008_v34, %v964_v14 }
 0x31b   : > { %v1172_v45 = vadd.f32 %v1168_v11, %v1128_v36  ;;  %v1173_v5 = vadd.f32 %v1169_v33, %v1129_v30  ;;  %v1174_v21 = vadd.f32 %v1170_v15, %v1130_v2  ;;  %v1175_v48 = vadd.f32 %v1171_v50, %v1131_v1  ;;  %v1073_v50 = vpop.permute.xlu0 %1072 }
 0x31c   : > { %v1057_v55 = vadd.f32 %v1053_v12, %v1009_v47  ;;  %v1058_v57 = vadd.f32 %v1054_v42, %v1010_v46  ;;  %v1059_v0 = vadd.f32 %v1055_v26, %v1011_v20  ;;  %v1060_v16 = vadd.f32 %v1056_v38, %v1012_v41 }
 0x31d   : > { %v1216_v49 = vadd.f32 %v1212_v59, %v1172_v45  ;;  %v1217_v10 = vadd.f32 %v1213_v35, %v1173_v5  ;;  %v1218_v27 = vadd.f32 %v1214_v37, %v1174_v21  ;;  %v1219_v23 = vadd.f32 %v1215_v9, %v1175_v48  ;;  %v2496_v59 = vld [vmem:[#allocation18_spill] sm:$0xff] }
 0x31e   : > { %v1256_v18 = vmul.f32 %v2344_v63, %v1015_v39  ;;  %v1257_v19 = vmul.f32 %v2347_v4, %v1015_v39  ;;  %v1258_v25 = vmul.f32 %v2350_v8, %v1015_v39  ;;  %v1259_v62 = vmul.f32 %v2353_v60, %v1015_v39  ;;  %v1064_v60 = vpop.permute.xlu1 %1063 }
 0x31f   : > { %v1366_v36 = vadd.f32 %v1362_v43, %v1322_v51  ;;  %v1367_v30 = vadd.f32 %v1363_v3, %v1323_v24  ;;  %v1368_v2 = vadd.f32 %v1364_v22, %v1324_v28  ;;  %v1369_v1 = vadd.f32 %v1365_v32, %v1325_v29  ;;  %v2494_v51 = vld [vmem:[#allocation16_spill] sm:$0xff]  ;;  %v2495_v28 = vld [vmem:[#allocation17_spill] sm:$0xff] }
 0x320   : > { %v1260_v56 = vadd.f32 %v1256_v18, %v1216_v49  ;;  %v1261_v34 = vadd.f32 %v1257_v19, %v1217_v10  ;;  %v1262_v20 = vadd.f32 %v1258_v25, %v1218_v27  ;;  %v1263_v44 = vadd.f32 %v1259_v62, %v1219_v23 }
 0x321   : > { %v1406_v21 = vmul.f32 %v2356_v31, %v2383_v58  ;;  %v1407_v63 = vmul.f32 %v2359_v7, %v2383_v58  ;;  %v1408_v4 = vmul.f32 %v2362_v40, %v2383_v58  ;;  %v1409_v8 = vmul.f32 %v2365_v61, %v2383_v58 }
 0x322   : > { %v1450_v45 = vmul.f32 %v2368_v17, %v1015_v39  ;;  %v1451_v24 = vmul.f32 %v2494_v51, %v1015_v39  ;;  %v1452_v29 = vmul.f32 %v2495_v28, %v1015_v39  ;;  %v1453_v35 = vmul.f32 %v2496_v59, %v1015_v39 }
 0x323   : > { %v1410_v37 = vadd.f32 %v1406_v21, %v1366_v36  ;;  %v1411_v31 = vadd.f32 %v1407_v63, %v1367_v30  ;;  %v1412_v9 = vadd.f32 %v1408_v4, %v1368_v2  ;;  %v1413_v54 = vadd.f32 %v1409_v8, %v1369_v1 }
 0x324   : > { %v1066_v7 = vmul.f32 %v1064_v60, %v1057_v55  ;;  %v1067_v6 = vmul.f32 %v1064_v60, %v1058_v57  ;;  %v1068_v11 = vmul.f32 %v1064_v60, %v1059_v0  ;;  %v1069_v40 = vmul.f32 %v1064_v60, %v1060_v16 }
 0x325   : > { %v1454_v33 = vadd.f32 %v1450_v45, %v1410_v37  ;;  %v1455_v15 = vadd.f32 %v1451_v24, %v1411_v31  ;;  %v1456_v61 = vadd.f32 %v1452_v29, %v1412_v9  ;;  %v1457_v58 = vadd.f32 %v1453_v35, %v1413_v54 }
 0x326   : > { %v1264_v17 = vmul.f32 %v1260_v56, %v1064_v60  ;;  %v1265_v43 = vmul.f32 %v1261_v34, %v1064_v60  ;;  %v1266_v3 = vmul.f32 %v1262_v20, %v1064_v60  ;;  %v1267_v22 = vmul.f32 %v1263_v44, %v1064_v60 }
 0x327   : > { %v1458_v32 = vmul.f32 %v1454_v33, %v1064_v60  ;;  %v1459_v52 = vmul.f32 %v1455_v15, %v1064_v60  ;;  %v1460_v39 = vmul.f32 %v1456_v61, %v1064_v60  ;;  %v1461_v13 = vmul.f32 %v1457_v58, %v1064_v60 }
 0x328   : > { %v1075_v53 = vadd.f32 %v1073_v50, %v1066_v7  ;;  %v1076_v14 = vadd.f32 %v1073_v50, %v1067_v6  ;;  %v1077_v12 = vadd.f32 %v1073_v50, %v1068_v11  ;;  %v1078_v42 = vadd.f32 %v1073_v50, %v1069_v40 }
 0x329   : > { %v1268_v26 = vadd.f32 %v1264_v17, %v1073_v50  ;;  %v1269_v38 = vadd.f32 %v1265_v43, %v1073_v50  ;;  %v1270_v47 = vadd.f32 %v1266_v3, %v1073_v50  ;;  %v1271_v46 = vadd.f32 %v1267_v22, %v1073_v50 }
 0x32a   : > { %v1079_v41 = vmax.f32 %v1075_v53, 0.0  ;;  %v1080_v5 = vmax.f32 %v1076_v14, 0.0  ;;  %v1081_v48 = vmax.f32 %v1077_v12, 0.0  ;;  %v1082_v55 = vmax.f32 %v1078_v42, 0.0 }
 0x32b   : > { %v1272_v57 = vmax.f32 %v1268_v26, 0.0  ;;  %v1273_v0 = vmax.f32 %v1269_v38, 0.0  ;;  %v1274_v16 = vmax.f32 %v1270_v47, 0.0  ;;  %v1275_v49 = vmax.f32 %v1271_v46, 0.0 }
 0x32c   : > { %1083 = vst [vmem:[#allocation9] sm:$0xff] %v1079_v41  ;;  %1084 = vst [vmem:[#allocation9 + $0x8] sm:$0xff] %v1080_v5  ;;  %v1462_v10 = vadd.f32 %v1458_v32, %v1073_v50  ;;  %v1463_v27 = vadd.f32 %v1459_v52, %v1073_v50  ;;  %v1464_v23 = vadd.f32 %v1460_v39, %v1073_v50 }
 0x32d   : > { %1085 = vst [vmem:[#allocation9 + $0x10] sm:$0xff] %v1081_v48  ;;  %1086 = vst [vmem:[#allocation9 + $0x18] sm:$0xff] %v1082_v55  ;;  %v1465_v18 = vadd.f32 %v1461_v13, %v1073_v50 }
 0x32e   : > { %1587 = vst [vmem:[#allocation9 + $0x20] sm:$0xff] %v1272_v57  ;;  %1588 = vst [vmem:[#allocation9 + $0x28] sm:$0xff] %v1273_v0  ;;  %v1466_v19 = vmax.f32 %v1462_v10, 0.0  ;;  %v1467_v25 = vmax.f32 %v1463_v27, 0.0  ;;  %v1468_v62 = vmax.f32 %v1464_v23, 0.0 }
 0x32f   : > { %1589 = vst [vmem:[#allocation9 + $0x30] sm:$0xff] %v1274_v16  ;;  %1590 = vst [vmem:[#allocation9 + $0x38] sm:$0xff] %v1275_v49  ;;  %v1469_v36 = vmax.f32 %v1465_v18, 0.0 }
 0x330   : > { %1591 = vst [vmem:[#allocation9 + $0x40] sm:$0xff] %v1466_v19  ;;  %1592 = vst [vmem:[#allocation9 + $0x48] sm:$0xff] %v1467_v25 }
 0x331   : > { %1593 = vst [vmem:[#allocation9 + $0x50] sm:$0xff] %v1468_v62  ;;  %1594 = vst [vmem:[#allocation9 + $0x58] sm:$0xff] %v1469_v36 }
 0x332 PF: > { %p2435_p10 = scmp.eq.s32.totalorder %s1575_s15, 1  ;;  %s1778_s20 = smov [#allocation9]  }
 0x333   : > { %s1494_s21 = sshll.u32 %s1778_s20, 4  ;;  %s1495_s21 = int_to_ptr.vmem [resolvable:$true] %s1494_s21 }
 0x334   : > { %s1706_s22 = scalar_lea.vmem %s1495_s21, 1536  ;;  %s1712_s23 = scalar_lea.vmem %s1495_s21, 3072 }
 0x335   : > { %p1707_p11 = scmp.ne.s32.totalorder %s1495_s21, %s1706_s22  ;;  %p1713_p0 = scmp.lt.s32.totalorder %s1495_s21, %s1495_s21 }
 0x336   : > { %p1714_p1 = scmp.lt.s32.totalorder %s1712_s23, %s1706_s22 }
 0x337   : > { %p1708_p12 = pnand %p1707_p11, %p2435_p10 }
 0x338   : > { %p1715_p2 = por %p1714_p1, %p1713_p0 }
 0x339   : > { %p1709_p13 = pneg %p1708_p12 }
 0x33b   : > { %p1716_p5 = pnand %p1715_p2, %p1709_p13 }
 0x33d   : > { %1719 = shalt.err (!%p1716_p5)
}
 0x33e   : > { %s1720_s25 = scalar_lea.hbm %s2472_s3, 1536 }
 0x33f   : > { %p1721_p7 = scmp.ne.s32.totalorder %s2472_s3, %s1720_s25  ;;  %p1726_p4 = scmp.lt.u32.totalorder %s1720_s25, %s2472_s3 }
 0x341   : > { %p1722_p9 = pnand %p1721_p7, %p2435_p10 }
 0x343   : > { %p1723_p3 = pneg %p1722_p9 }
 0x345   : > { %p1728_p6 = pnand %p1726_p4, %p1723_p3 }
 0x347   : > { %1731 = shalt.err (!%p1728_p6)
}
 0x348   : > { %s1779_s30 = smov 512   ;;  %s1780_s4 = smov 32  }
 0x349   : > { %1608 = dma.vmem_to_hbm [thread:$0]  (%p2435_p10), %s1495_s21, 1536, %s2472_s3, [#allocation8], %s1779_s30, %s1779_s30, %s1780_s4  }
 0x34a PF: > { %p1622_p8 = scmp.ge.s32.totalorder %s1762_s14, 2  ;;  %p1623_p11 = scmp.eq.s32.totalorder %s1576_s16, 1 }
 0x34c   : > { %p1616_p12 = pnand %p1623_p11, %p1622_p8 }
 0x34e   : > { %1749 = dma.done.wait (!%p1616_p12), [#allocation8], 1536  }
 0x34f   : > { %1751 = vsyncadd (!%p1616_p12), [#allocation8], 4294965760  ;;  %s17_s14 = sadd.s32 1, %s1762_s14   ;;  %s2498_s12 = smov %s1758_s13 }
 0x350   : > { %p14_p13 = scmp.ge.s32.totalorder %s17_s14, 4   ;;  %s2499_s13 = smov %s2501_s17 }
 0x352   :  { %16 = sbr.rel (!%p14_p13) target bundleno = 4 (0x4), region = 92 }
 0x359   :  { %1515 = vsyncpa [#allocation7], 1 }
 0x35a   :  { %1517 = vsyncpa [#allocation7 + $0x1], 1 }
 0x35b   :  { %1518 = vsyncpa [#allocation8], 1 }
 0x35c   :  { %1520 = vsyncpa [#allocation8 + $0x1], 1 }

</bundles_post_ra>
